<compile_context>
chip_gen: v5e
topology: v5e:2x2
jax: 0.10.0
libtpu: 0.0.40
codegen_flags: <defaults>
</compile_context>

<pallas_src>
import jax
import jax.numpy as jnp
from jax.experimental import pallas as pl
from jax.experimental.pallas import tpu as pltpu

IN_FEATURES = 256 * 9   # 2304
HIDDEN = 256
OUT = 1
OUT_PAD = 128           # lane-dense output width (real result in lane 0)
MAX_TILE = 1024         # batch tile cap (fits 32 MiB scoped VMEM with f32 x)


def _round_up(x, m):
    return ((x + m - 1) // m) * m


def _leaky_relu(x, slope=0.2):
    return jnp.where(x > 0, x, slope * x)


def disc2_kernel(x_ref, w1_ref, b1_ref, w2_ref, b2_ref, w3_ref, b3_ref, o_ref):
    # x arrives f32 from HBM; cast to bf16 in-register for the MXU (saves the
    # separate wrapper convert pass over x).
    x = x_ref[...].astype(jnp.bfloat16)

    # Layer 1: (TB, 2304) @ (2304, 256) -> f32 accum, + bias, LeakyReLU
    h = jnp.dot(x, w1_ref[...], preferred_element_type=jnp.float32) + b1_ref[...]
    h = _leaky_relu(h)

    # Layer 2: (TB, 256) @ (256, 256)
    h = jnp.dot(h.astype(jnp.bfloat16), w2_ref[...],
                preferred_element_type=jnp.float32) + b2_ref[...]
    h = _leaky_relu(h)

    # Layer 3 (lane-dense): (TB, 256) @ (256, 128); only lane 0 is real,
    # lanes 1..127 are zero-weight padding -> sigmoid(0)=0.5, sliced off.
    h = jnp.dot(h.astype(jnp.bfloat16), w3_ref[...],
                preferred_element_type=jnp.float32) + b3_ref[...]
    o_ref[...] = jax.nn.sigmoid(h).astype(o_ref.dtype)


def prepare_params(params):
    """One-time, per-model layout prep (hoisted out of the per-call path)."""
    w1, b1, w2, b2, w3, b3 = params
    w1b = w1.astype(jnp.bfloat16)
    w2b = w2.astype(jnp.bfloat16)
    w3p = jnp.pad(w3, ((0, 0), (0, OUT_PAD - OUT))).astype(jnp.bfloat16)
    b3p = jnp.pad(b3, ((0, 0), (0, OUT_PAD - OUT)))
    # b1 / b2 / b3p stay f32 (added onto the f32 accumulator).
    return (w1b, b1, w2b, b2, w3p, b3p)


def discriminator2_forward(img, prepared_params):
    """img: (B, 256, 3, 3) float32 (NCHW). Returns (B, 1) validity (f32)."""
    b = img.shape[0]
    x = img.reshape(b, -1)  # == torch img.view(B, -1); contiguous, free in XLA
    assert x.shape[1] == IN_FEATURES

    w1b, b1, w2b, b2, w3p, b3p = prepared_params

    # Minimal batch padding: only up to a multiple of 8 (sublane), never up to
    # a full tile.  For the common multiple-of-8 batch this is a no-op.
    b8 = _round_up(b, 8)
    if b8 != b:
        x = jnp.pad(x, ((0, b8 - b), (0, 0)))

    # Tile selection: >= 2 grid steps whenever b8 > 8 (both v7x TCs busy),
    # capped at MAX_TILE.  By construction tb <= b8, so ragged tail blocks
    # (handled by Pallas, discarded by the [:b] slice) never exceed the array.
    tb = min(MAX_TILE, _round_up(pl.cdiv(b8, 2), 8))
    grid_steps = pl.cdiv(b8, tb)
    rows = grid_steps * tb  # rows actually DMA'd / computed

    cost = pl.CostEstimate(
        flops=2 * rows * (IN_FEATURES * HIDDEN + HIDDEN * HIDDEN + HIDDEN * OUT_PAD),
        transcendentals=rows * OUT_PAD,
        bytes_accessed=(rows * IN_FEATURES * 4            # x (f32, read once)
                        + IN_FEATURES * HIDDEN * 2        # w1 (bf16)
                        + HIDDEN * HIDDEN * 2             # w2 (bf16)
                        + HIDDEN * OUT_PAD * 2            # w3 padded (bf16)
                        + (HIDDEN + HIDDEN + OUT_PAD) * 4  # biases (f32)
                        + rows * OUT_PAD * 2),            # output (bf16)
    )

    out = pl.pallas_call(
        disc2_kernel,
        out_shape=jax.ShapeDtypeStruct((b8, OUT_PAD), jnp.bfloat16),
        grid=(grid_steps,),
        in_specs=[
            pl.BlockSpec((tb, IN_FEATURES), lambda i: (i, 0)),       # x (tiled)
            pl.BlockSpec((IN_FEATURES, HIDDEN), lambda i: (0, 0)),   # w1 resident
            pl.BlockSpec((1, HIDDEN), lambda i: (0, 0)),             # b1 resident
            pl.BlockSpec((HIDDEN, HIDDEN), lambda i: (0, 0)),        # w2 resident
            pl.BlockSpec((1, HIDDEN), lambda i: (0, 0)),             # b2 resident
            pl.BlockSpec((HIDDEN, OUT_PAD), lambda i: (0, 0)),       # w3 resident
            pl.BlockSpec((1, OUT_PAD), lambda i: (0, 0)),            # b3 resident
        ],
        out_specs=pl.BlockSpec((tb, OUT_PAD), lambda i: (i, 0)),
        compiler_params=pltpu.CompilerParams(
            dimension_semantics=("parallel",),
            # Explicit limit: v5e default scoped VMEM is 16 MiB, which would
            # reject the f32 x double-buffer at tb=1024; 32 MiB is safe on
            # v5e/v6e and within v7x's 64 MiB physical VMEM.
            vmem_limit_bytes=32 * 1024 * 1024,
        ),
        cost_estimate=cost,
    )(x, w1b, b1, w2b, b2, w3p, b3p)

    # Drop batch padding / tail rows and the 127 padded output lanes.
    return out[:b, :OUT].astype(jnp.float32)


def init_params(key):
    """Deterministic init mimicking torch.nn.Linear default (U[-1/sqrt(fan_in), +])."""
    ks = jax.random.split(key, 6)

    def lin(kw, kb, fan_in, fan_out):
        bound = 1.0 / jnp.sqrt(jnp.float32(fan_in))
        # stored as (in, out) so the kernel computes x @ W
        w = jax.random.uniform(kw, (fan_in, fan_out), jnp.float32, -bound, bound)
        b = jax.random.uniform(kb, (1, fan_out), jnp.float32, -bound, bound)
        return w, b

    w1, b1 = lin(ks[0], ks[1], IN_FEATURES, HIDDEN)
    w2, b2 = lin(ks[2], ks[3], HIDDEN, HIDDEN)
    w3, b3 = lin(ks[4], ks[5], HIDDEN, OUT)
    return (w1, b1, w2, b2, w3, b3)


def reference_forward(img, params):
    """Pure-JAX reference mirroring the kernel's bf16-operand / f32-accum math."""
    w1, b1, w2, b2, w3, b3 = params
    x = img.reshape(img.shape[0], -1).astype(jnp.bfloat16)
    h = jnp.dot(x, w1.astype(jnp.bfloat16),
                preferred_element_type=jnp.float32) + b1
    h = _leaky_relu(h)
    h = jnp.dot(h.astype(jnp.bfloat16), w2.astype(jnp.bfloat16),
                preferred_element_type=jnp.float32) + b2
    h = _leaky_relu(h)
    h = jnp.dot(h.astype(jnp.bfloat16), w3.astype(jnp.bfloat16),
                preferred_element_type=jnp.float32) + b3
    return jax.nn.sigmoid(h)


if __name__ == "__main__":
    key = jax.random.PRNGKey(0)
    k_img, k_par = jax.random.split(key)

    # Module's forward implies an input that flattens to 256*9 = 2304 features,
    # i.e. (B, 256, 3, 3) in NCHW. Use a small batch.
    B = 2
    img = jax.random.normal(k_img, (B, 256, 3, 3), dtype=jnp.float32)
    params = init_params(k_par)
    prepared = prepare_params(params)

    out = discriminator2_forward(img, prepared)
    out = jax.block_until_ready(out)

    ref = reference_forward(img, params)
    assert out.shape == (B, 1)
    # Kernel output is bf16-rounded sigmoid in [0,1]; bf16 spacing near 1 is
    # ~4e-3, so compare with 1e-2 tolerances.
    assert jnp.allclose(out, ref, atol=1e-2, rtol=1e-2), "mismatch vs JAX reference"

    print("KERNEL_OK")
</pallas_src>

<mosaic_0001>
module attributes {stable_mosaic.version = 11 : i64} {
  func.func @disc2_kernel(%arg0: i32, %arg1: memref<8x2304xf32, #tpu.memory_space<vmem>>, %arg2: memref<2304x256xbf16, #tpu.memory_space<vmem>>, %arg3: memref<1x256xf32, #tpu.memory_space<vmem>>, %arg4: memref<256x256xbf16, #tpu.memory_space<vmem>>, %arg5: memref<1x256xf32, #tpu.memory_space<vmem>>, %arg6: memref<256x128xbf16, #tpu.memory_space<vmem>>, %arg7: memref<1x128xf32, #tpu.memory_space<vmem>>, %arg8: memref<8x128xbf16, #tpu.memory_space<vmem>>) attributes {dimension_semantics = [#tpu.dimension_semantics<parallel>], iteration_bounds = array<i64: 1>, scalar_prefetch = 0 : i64, scratch_operands = 0 : i64, tpu.core_type = #tpu.core_type<tc>, window_params = [{transform_indices = @transform_0, window_bounds = array<i64: 8, 2304>}, {pipeline_mode = #tpu.pipeline_mode<synchronous>, transform_indices = @transform_1, window_bounds = array<i64: 2304, 256>}, {pipeline_mode = #tpu.pipeline_mode<synchronous>, transform_indices = @transform_2, window_bounds = array<i64: 1, 256>}, {pipeline_mode = #tpu.pipeline_mode<synchronous>, transform_indices = @transform_3, window_bounds = array<i64: 256, 256>}, {pipeline_mode = #tpu.pipeline_mode<synchronous>, transform_indices = @transform_4, window_bounds = array<i64: 1, 256>}, {pipeline_mode = #tpu.pipeline_mode<synchronous>, transform_indices = @transform_5, window_bounds = array<i64: 256, 128>}, {pipeline_mode = #tpu.pipeline_mode<synchronous>, transform_indices = @transform_6, window_bounds = array<i64: 1, 128>}, {transform_indices = @transform_7, window_bounds = array<i64: 8, 128>}]} {
    %c0 = arith.constant 0 : index
    %c0_0 = arith.constant 0 : index
    %0 = vector.load %arg1[%c0, %c0_0] : memref<8x2304xf32, #tpu.memory_space<vmem>>, vector<8x2304xf32>
    %1 = arith.truncf %0 : vector<8x2304xf32> to vector<8x2304xbf16>
    %c0_1 = arith.constant 0 : index
    %c0_2 = arith.constant 0 : index
    %2 = vector.load %arg2[%c0_1, %c0_2] : memref<2304x256xbf16, #tpu.memory_space<vmem>>, vector<2304x256xbf16>
    %cst = arith.constant dense<0.000000e+00> : vector<8x256xf32>
    %3 = tpu.matmul %1, %2, %cst {dimension_numbers = #tpu.dot_dimension_numbers<[1], [0], [0], [1], [0, 0, 1, 1], [], []>} : vector<8x2304xbf16>, vector<2304x256xbf16>, vector<8x256xf32> -> vector<8x256xf32>
    %c0_3 = arith.constant 0 : index
    %c0_4 = arith.constant 0 : index
    %4 = vector.load %arg3[%c0_3, %c0_4] : memref<1x256xf32, #tpu.memory_space<vmem>>, vector<1x256xf32>
    %5 = vector.broadcast %4 : vector<1x256xf32> to vector<8x256xf32>
    %6 = arith.addf %3, %5 : vector<8x256xf32>
    %cst_5 = arith.constant 0.000000e+00 : f32
    %7 = vector.broadcast %cst_5 : f32 to vector<8x256xf32>
    %8 = arith.cmpf ogt, %6, %7 : vector<8x256xf32>
    %cst_6 = arith.constant 2.000000e-01 : f32
    %9 = vector.broadcast %cst_6 : f32 to vector<8x256xf32>
    %10 = arith.mulf %9, %6 : vector<8x256xf32>
    %11 = arith.select %8, %6, %10 : vector<8x256xi1>, vector<8x256xf32>
    %12 = arith.truncf %11 : vector<8x256xf32> to vector<8x256xbf16>
    %c0_7 = arith.constant 0 : index
    %c0_8 = arith.constant 0 : index
    %13 = vector.load %arg4[%c0_7, %c0_8] : memref<256x256xbf16, #tpu.memory_space<vmem>>, vector<256x256xbf16>
    %cst_9 = arith.constant dense<0.000000e+00> : vector<8x256xf32>
    %14 = tpu.matmul %12, %13, %cst_9 {dimension_numbers = #tpu.dot_dimension_numbers<[1], [0], [0], [1], [0, 0, 1, 1], [], []>} : vector<8x256xbf16>, vector<256x256xbf16>, vector<8x256xf32> -> vector<8x256xf32>
    %c0_10 = arith.constant 0 : index
    %c0_11 = arith.constant 0 : index
    %15 = vector.load %arg5[%c0_10, %c0_11] : memref<1x256xf32, #tpu.memory_space<vmem>>, vector<1x256xf32>
    %16 = vector.broadcast %15 : vector<1x256xf32> to vector<8x256xf32>
    %17 = arith.addf %14, %16 : vector<8x256xf32>
    %cst_12 = arith.constant 0.000000e+00 : f32
    %18 = vector.broadcast %cst_12 : f32 to vector<8x256xf32>
    %19 = arith.cmpf ogt, %17, %18 : vector<8x256xf32>
    %cst_13 = arith.constant 2.000000e-01 : f32
    %20 = vector.broadcast %cst_13 : f32 to vector<8x256xf32>
    %21 = arith.mulf %20, %17 : vector<8x256xf32>
    %22 = arith.select %19, %17, %21 : vector<8x256xi1>, vector<8x256xf32>
    %23 = arith.truncf %22 : vector<8x256xf32> to vector<8x256xbf16>
    %c0_14 = arith.constant 0 : index
    %c0_15 = arith.constant 0 : index
    %24 = vector.load %arg6[%c0_14, %c0_15] : memref<256x128xbf16, #tpu.memory_space<vmem>>, vector<256x128xbf16>
    %cst_16 = arith.constant dense<0.000000e+00> : vector<8x128xf32>
    %25 = tpu.matmul %23, %24, %cst_16 {dimension_numbers = #tpu.dot_dimension_numbers<[1], [0], [0], [1], [0, 0, 1, 1], [], []>} : vector<8x256xbf16>, vector<256x128xbf16>, vector<8x128xf32> -> vector<8x128xf32>
    %c0_17 = arith.constant 0 : index
    %c0_18 = arith.constant 0 : index
    %26 = vector.load %arg7[%c0_17, %c0_18] : memref<1x128xf32, #tpu.memory_space<vmem>>, vector<1x128xf32>
    %27 = vector.broadcast %26 : vector<1x128xf32> to vector<8x128xf32>
    %28 = arith.addf %25, %27 : vector<8x128xf32>
    %29 = arith.negf %28 : vector<8x128xf32>
    %30 = math.exp %29 : vector<8x128xf32>
    %cst_19 = arith.constant 1.000000e+00 : f32
    %31 = vector.broadcast %cst_19 : f32 to vector<8x128xf32>
    %32 = arith.addf %31, %30 : vector<8x128xf32>
    %33 = arith.divf %31, %32 : vector<8x128xf32>
    %34 = arith.truncf %33 : vector<8x128xf32> to vector<8x128xbf16>
    %c0_20 = arith.constant 0 : index
    %c0_21 = arith.constant 0 : index
    %35 = vector.load %arg8[%c0_20, %c0_21] : memref<8x128xbf16, #tpu.memory_space<vmem>>, vector<8x128xbf16>
    tpu.vector_store %arg8[%c0_20, %c0_21], %34 {strides = array<i32>} : memref<8x128xbf16, #tpu.memory_space<vmem>>, vector<8x128xbf16>,
    return
  }
  func.func @transform_0(%arg0: i32) -> (i32, i32) {
    %c0_i32 = arith.constant 0 : i32
    %c0_i32_0 = arith.constant 0 : i32
    return %arg0, %c0_i32 : i32, i32
  }
  func.func @transform_1(%arg0: i32) -> (i32, i32) {
    %c0_i32 = arith.constant 0 : i32
    %c0_i32_0 = arith.constant 0 : i32
    %c0_i32_1 = arith.constant 0 : i32
    return %c0_i32, %c0_i32_0 : i32, i32
  }
  func.func @transform_2(%arg0: i32) -> (i32, i32) {
    %c0_i32 = arith.constant 0 : i32
    %c0_i32_0 = arith.constant 0 : i32
    %c0_i32_1 = arith.constant 0 : i32
    return %c0_i32, %c0_i32_0 : i32, i32
  }
  func.func @transform_3(%arg0: i32) -> (i32, i32) {
    %c0_i32 = arith.constant 0 : i32
    %c0_i32_0 = arith.constant 0 : i32
    %c0_i32_1 = arith.constant 0 : i32
    return %c0_i32, %c0_i32_0 : i32, i32
  }
  func.func @transform_4(%arg0: i32) -> (i32, i32) {
    %c0_i32 = arith.constant 0 : i32
    %c0_i32_0 = arith.constant 0 : i32
    %c0_i32_1 = arith.constant 0 : i32
    return %c0_i32, %c0_i32_0 : i32, i32
  }
  func.func @transform_5(%arg0: i32) -> (i32, i32) {
    %c0_i32 = arith.constant 0 : i32
    %c0_i32_0 = arith.constant 0 : i32
    %c0_i32_1 = arith.constant 0 : i32
    return %c0_i32, %c0_i32_0 : i32, i32
  }
  func.func @transform_6(%arg0: i32) -> (i32, i32) {
    %c0_i32 = arith.constant 0 : i32
    %c0_i32_0 = arith.constant 0 : i32
    %c0_i32_1 = arith.constant 0 : i32
    return %c0_i32, %c0_i32_0 : i32, i32
  }
  func.func @transform_7(%arg0: i32) -> (i32, i32) {
    %c0_i32 = arith.constant 0 : i32
    %c0_i32_0 = arith.constant 0 : i32
    return %arg0, %c0_i32 : i32, i32
  }
}

</mosaic_0001>

<bundles_post_ra>
// kernel: tpu_custom_call.1
= control target key start
LH: loop header
LB: loop body
LE: loop exit
PB: predicated region body
PF: predicated region fallthrough
CT: control target
= control target key end

     0   :  { %12 = vsyncpa [#allocation3], 0  ;;  %s4925_s0 = inlined_call_operand.hbm [shape: f32[8,2304], index: 0, kind: input, shape index: {}]   ;;  %s4926_s1 = inlined_call_operand.hbm [shape: bf16[2304,256], index: 1, kind: input, shape index: {}]   ;;  %s4927_s2 = inlined_call_operand.hbm [shape: f32[1,256], index: 2, kind: input, shape index: {}]   ;;  %s4928_s3 = inlined_call_operand.hbm [shape: bf16[256,256], index: 3, kind: input, shape index: {}]   ;;  %s4929_s4 = inlined_call_operand.hbm [shape: f32[1,256], index: 4, kind: input, shape index: {}]   ;;  %s4930_s5 = inlined_call_operand.hbm [shape: bf16[256,128], index: 5, kind: input, shape index: {}]   ;;  %s4931_s6 = inlined_call_operand.hbm [shape: f32[1,128], index: 6, kind: input, shape index: {}]   ;;  %s4932_s7 = inlined_call_operand.hbm [shape: bf16[8,128], index: 7, kind: output, shape index: {}]  }
   0x1   :  { %13 = vsyncpa [#allocation6], 0 }
   0x2   :  { %14 = vsyncpa [#allocation9], 0 }
   0x3   :  { %15 = vsyncpa [#allocation12], 0  ;;  %s32_s26 = sshll.u32 %s4926_s1, 4  ;;  %s33_s26 = int_to_ptr.hbm [resolvable:$true] %s32_s26 }
   0x4   :  { %16 = vsyncpa [#allocation4], 0  ;;  %s4732_s27 = smov [#allocation5]   ;;  %s56_s8 = sshll.u32 %s4928_s3, 4  ;;  %s57_s8 = int_to_ptr.hbm [resolvable:$true] %s56_s8 }
   0x5   :  { %s34_s28 = sshll.u32 %s4732_s27, 4  ;;  %s4733_s9 = smov 128   ;;  %s35_s28 = int_to_ptr.vmem [resolvable:$true] %s34_s28 }
   0x6   :  { %s4734_s10 = smov 8   ;;  %s4735_s11 = smov [#allocation8]  }
   0x7   :  { %40 = dma.hbm_to_vmem [thread:$0]  %s33_s26, 36864, %s35_s28, [#allocation6], %s4733_s9, %s4733_s9, %s4734_s10  }
   0x8   :  { %s58_s12 = sshll.u32 %s4735_s11, 4  ;;  %s80_s15 = sshll.u32 %s4930_s5, 4  ;;  %s59_s12 = int_to_ptr.vmem [resolvable:$true] %s58_s12  ;;  %s81_s15 = int_to_ptr.hbm [resolvable:$true] %s80_s15 }
   0x9   :  { %64 = dma.hbm_to_vmem [thread:$0]  %s57_s8, 4096, %s59_s12, [#allocation9], %s4733_s9, %s4733_s9, %s4734_s10  }
   0xa   :  { %s4736_s1 = smov [#allocation11]   ;;  %s22_s3 = sshll.u32 %s4925_s0, 4  ;;  %s23_s3 = int_to_ptr.hbm [resolvable:$true] %s22_s3 }
   0xb   :  { %s82_s16 = sshll.u32 %s4736_s1, 4  ;;  %s4737_s19 = smov 64   ;;  %s83_s16 = int_to_ptr.vmem [resolvable:$true] %s82_s16 }
   0xc   :  { %s4738_s20 = smov 4   ;;  %s4739_s21 = smov [#allocation2]  }
   0xd   :  { %88 = dma.hbm_to_vmem [thread:$0]  %s81_s15, 2048, %s83_s16, [#allocation12], %s4737_s19, %s4737_s19, %s4738_s20  }
   0xe   :  { %s24_s22 = sshll.u32 %s4739_s21, 4  ;;  %s46_s5 = sshll.u32 %s4927_s2, 4  ;;  %s25_s22 = int_to_ptr.vmem [resolvable:$true] %s24_s22  ;;  %s47_s5 = int_to_ptr.hbm [resolvable:$true] %s46_s5 }
   0xf   :  { %27 = dma.hbm_to_vmem [thread:$0]  %s23_s3, 2304, %s25_s22, [#allocation3]  }
  0x10   :  { %s70_s27 = sshll.u32 %s4929_s4, 4  ;;  %s4740_s28 = smov [#allocation7]   ;;  %s71_s27 = int_to_ptr.hbm [resolvable:$true] %s70_s27 }
  0x11   :  { %s48_s29 = sshll.u32 %s4740_s28, 4  ;;  %s4741_s0 = smov [#allocation10]   ;;  %s49_s29 = int_to_ptr.vmem [resolvable:$true] %s48_s29 }
  0x12   :  { %51 = dma.hbm_to_vmem [thread:$0]  %s47_s5, 32, %s49_s29, [#allocation6]  }
  0x13   :  { %s72_s30 = sshll.u32 %s4741_s0, 4  ;;  %s94_s10 = sshll.u32 %s4931_s6, 4  ;;  %s73_s30 = int_to_ptr.vmem [resolvable:$true] %s72_s30  ;;  %s95_s10 = int_to_ptr.hbm [resolvable:$true] %s94_s10 }
  0x14   :  { %75 = dma.hbm_to_vmem [thread:$0]  %s71_s27, 32, %s73_s30, [#allocation9]  }
  0x15   :  { %s4742_s2 = smov [#allocation13]  }
  0x16   :  { %s96_s11 = sshll.u32 %s4742_s2, 4  ;;  %s97_s11 = int_to_ptr.vmem [resolvable:$true] %s96_s11 }
  0x17   :  { %99 = dma.hbm_to_vmem [thread:$0]  %s95_s10, 16, %s97_s11, [#allocation12]  }
  0x18   :  { %4722 = dma.done.wait [#allocation3], 2304  }
  0x19   :  { %4723 = vsyncadd [#allocation3], 4294964992 }
  0x1a   :  { %4724 = dma.done.wait [#allocation6], 36896  }
  0x1b   :  { %4725 = vsyncadd [#allocation6], 4294930400 }
  0x1c   :  { %4726 = dma.done.wait [#allocation9], 4128  }
  0x1d   :  { %4727 = vsyncadd [#allocation9], 4294963168 }
  0x1e   :  { %4728 = dma.done.wait [#allocation12], 2064  }
  0x1f   :  { %4729 = vsyncadd [#allocation12], 4294965232  ;;  %v2889_v0 = vld [vmem:[#allocation5 + $0x70] sm:$0xf]  ;;  %v4191_v1 = vld [vmem:[#allocation5 + $0x74] sm:$0xf0] }
  0x20   :  { %v2953_v2 = vld [vmem:[#allocation5 + $0xf0] sm:$0xf]  ;;  %v2890_v3 = vor.u32 %v4191_v1, %v2889_v0  ;;  %v4207_v4 = vld [vmem:[#allocation5 + $0xf4] sm:$0xf0]  ;;  %v2881_v11 = vld [vmem:[#allocation5 + $0x60] sm:$0xf] }
  0x21   :  { %v3017_v5 = vld [vmem:[#allocation5 + $0x170] sm:$0xf]  ;;  %v4223_v6 = vld [vmem:[#allocation5 + $0x174] sm:$0xf0]  ;;  %v2954_v7 = vor.u32 %v4207_v4, %v2953_v2  ;;  %v4189_v13 = vld [vmem:[#allocation5 + $0x64] sm:$0xf0] }
  0x22   :  { %v3018_v8 = vor.u32 %v4223_v6, %v3017_v5  ;;  %v3081_v9 = vld [vmem:[#allocation5 + $0x1f0] sm:$0xf]  ;;  %v4239_v10 = vld [vmem:[#allocation5 + $0x1f4] sm:$0xf0]  ;;  %1898 = vmatpush.bf16.msra.mxu0 %v2890_v3  ;;  %v2945_v14 = vld [vmem:[#allocation5 + $0xe0] sm:$0xf]  ;;  %v2882_v16 = vor.u32 %v4189_v13, %v2881_v11 }
  0x23   :  { %v3082_v12 = vor.u32 %v4239_v10, %v3081_v9  ;;  %v4205_v15 = vld [vmem:[#allocation5 + $0xe4] sm:$0xf0]  ;;  %1911 = vmatpush.bf16.msra.mxu1 %v2954_v7  ;;  %v3009_v18 = vld [vmem:[#allocation5 + $0x160] sm:$0xf]  ;;  %v2873_v23 = vld [vmem:[#allocation5 + $0x50] sm:$0xf] }
  0x24   :  { %1924 = vmatpush.bf16.msra.mxu2 %v3018_v8  ;;  %v2946_v17 = vor.u32 %v4205_v15, %v2945_v14  ;;  %v4221_v19 = vld [vmem:[#allocation5 + $0x164] sm:$0xf0]  ;;  %v3073_v20 = vld [vmem:[#allocation5 + $0x1e0] sm:$0xf]  ;;  %v4187_v24 = vld [vmem:[#allocation5 + $0x54] sm:$0xf0] }
  0x25   :  { %1937 = vmatpush.bf16.msra.mxu3 %v3082_v12  ;;  %v3010_v21 = vor.u32 %v4221_v19, %v3009_v18  ;;  %v4237_v22 = vld [vmem:[#allocation5 + $0x1e4] sm:$0xf0]  ;;  %v2937_v26 = vld [vmem:[#allocation5 + $0xd0] sm:$0xf]  ;;  %v4203_v27 = vld [vmem:[#allocation5 + $0xd4] sm:$0xf0]  ;;  %v2874_v29 = vor.u32 %v4187_v24, %v2873_v23 }
  0x26   :  { %v3074_v25 = vor.u32 %v4237_v22, %v3073_v20  ;;  %v3001_v28 = vld [vmem:[#allocation5 + $0x150] sm:$0xf]  ;;  %1899 = vmatpush.bf16.msra.mxu0 %v2882_v16  ;;  %v4219_v30 = vld [vmem:[#allocation5 + $0x154] sm:$0xf0]  ;;  %v2938_v33 = vor.u32 %v4203_v27, %v2937_v26  ;;  %v2865_v35 = vld [vmem:[#allocation5 + $0x40] sm:$0xf] }
  0x27   :  { %v3065_v31 = vld [vmem:[#allocation5 + $0x1d0] sm:$0xf]  ;;  %v4235_v32 = vld [vmem:[#allocation5 + $0x1d4] sm:$0xf0]  ;;  %1912 = vmatpush.bf16.msra.mxu1 %v2946_v17  ;;  %v3002_v34 = vor.u32 %v4219_v30, %v3001_v28  ;;  %v4185_v36 = vld [vmem:[#allocation5 + $0x44] sm:$0xf0] }
  0x28   :  { %1925 = vmatpush.bf16.msra.mxu2 %v3010_v21  ;;  %v2929_v37 = vld [vmem:[#allocation5 + $0xc0] sm:$0xf]  ;;  %v3066_v38 = vor.u32 %v4235_v32, %v3065_v31  ;;  %v4201_v39 = vld [vmem:[#allocation5 + $0xc4] sm:$0xf0]  ;;  %v2866_v44 = vor.u32 %v4185_v36, %v2865_v35  ;;  %v2857_v47 = vld [vmem:[#allocation5 + $0x30] sm:$0xf] }
  0x29   :  { %1938 = vmatpush.bf16.msra.mxu3 %v3074_v25  ;;  %v2993_v40 = vld [vmem:[#allocation5 + $0x140] sm:$0xf]  ;;  %v4217_v41 = vld [vmem:[#allocation5 + $0x144] sm:$0xf0]  ;;  %v2930_v45 = vor.u32 %v4201_v39, %v2929_v37  ;;  %v4183_v48 = vld [vmem:[#allocation5 + $0x34] sm:$0xf0] }
  0x2a   :  { %v3057_v42 = vld [vmem:[#allocation5 + $0x1c0] sm:$0xf]  ;;  %v4233_v43 = vld [vmem:[#allocation5 + $0x1c4] sm:$0xf0]  ;;  %1900 = vmatpush.bf16.msra.mxu0 %v2874_v29  ;;  %v2994_v46 = vor.u32 %v4217_v41, %v2993_v40  ;;  %v2921_v49 = vld [vmem:[#allocation5 + $0xb0] sm:$0xf]  ;;  %v2858_v56 = vor.u32 %v4183_v48, %v2857_v47 }
  0x2b   :  { %1913 = vmatpush.bf16.msra.mxu1 %v2938_v33  ;;  %v3058_v50 = vor.u32 %v4233_v43, %v3057_v42  ;;  %v4199_v51 = vld [vmem:[#allocation5 + $0xb4] sm:$0xf0]  ;;  %v2985_v52 = vld [vmem:[#allocation5 + $0x130] sm:$0xf]  ;;  %v2849_v59 = vld [vmem:[#allocation5 + $0x20] sm:$0xf] }
  0x2c   :  { %1926 = vmatpush.bf16.msra.mxu2 %v3002_v34  ;;  %v4215_v53 = vld [vmem:[#allocation5 + $0x134] sm:$0xf0]  ;;  %v3049_v54 = vld [vmem:[#allocation5 + $0x1b0] sm:$0xf]  ;;  %v2922_v57 = vor.u32 %v4199_v51, %v2921_v49  ;;  %v4181_v60 = vld [vmem:[#allocation5 + $0x24] sm:$0xf0] }
  0x2d   :  { %1939 = vmatpush.bf16.msra.mxu3 %v3066_v38  ;;  %v4231_v55 = vld [vmem:[#allocation5 + $0x1b4] sm:$0xf0]  ;;  %v2986_v58 = vor.u32 %v4215_v53, %v2985_v52  ;;  %v2913_v61 = vld [vmem:[#allocation5 + $0xa0] sm:$0xf]  ;;  %v4197_v63 = vld [vmem:[#allocation5 + $0xa4] sm:$0xf0]  ;;  %v2850_v4 = vor.u32 %v4181_v60, %v2849_v59 }
  0x2e   :  { %1901 = vmatpush.bf16.msra.mxu0 %v2866_v44  ;;  %v3050_v62 = vor.u32 %v4231_v55, %v3049_v54  ;;  %v2977_v0 = vld [vmem:[#allocation5 + $0x120] sm:$0xf]  ;;  %v4213_v1 = vld [vmem:[#allocation5 + $0x124] sm:$0xf0]  ;;  %v2914_v5 = vor.u32 %v4197_v63, %v2913_v61  ;;  %v2841_v7 = vld [vmem:[#allocation5 + $0x10] sm:$0xf] }
  0x2f   :  { %1914 = vmatpush.bf16.msra.mxu1 %v2930_v45  ;;  %v3041_v2 = vld [vmem:[#allocation5 + $0x1a0] sm:$0xf]  ;;  %v4229_v3 = vld [vmem:[#allocation5 + $0x1a4] sm:$0xf0]  ;;  %v2978_v6 = vor.u32 %v4213_v1, %v2977_v0  ;;  %v4179_v8 = vld [vmem:[#allocation5 + $0x14] sm:$0xf0] }
  0x30   :  { %1927 = vmatpush.bf16.msra.mxu2 %v2994_v46  ;;  %v2905_v9 = vld [vmem:[#allocation5 + $0x90] sm:$0xf]  ;;  %v3042_v10 = vor.u32 %v4229_v3, %v3041_v2  ;;  %v4195_v11 = vld [vmem:[#allocation5 + $0x94] sm:$0xf0]  ;;  %v2842_v16 = vor.u32 %v4179_v8, %v2841_v7  ;;  %v2833_v17 = vld [vmem:[#allocation5] sm:$0xf] }
  0x31   :  { %1940 = vmatpush.bf16.msra.mxu3 %v3058_v50  ;;  %v2969_v12 = vld [vmem:[#allocation5 + $0x110] sm:$0xf]  ;;  %v4211_v13 = vld [vmem:[#allocation5 + $0x114] sm:$0xf0]  ;;  %v4177_v18 = vld [vmem:[#allocation5 + $0x4] sm:$0xf0]  ;;  %v2906_v19 = vor.u32 %v4195_v11, %v2905_v9 }
  0x32   :  { %1902 = vmatpush.bf16.msra.mxu0 %v2858_v56  ;;  %v3033_v14 = vld [vmem:[#allocation5 + $0x190] sm:$0xf]  ;;  %v4227_v15 = vld [vmem:[#allocation5 + $0x194] sm:$0xf0]  ;;  %v2970_v20 = vor.u32 %v4211_v13, %v2969_v12  ;;  %v2897_v21 = vld [vmem:[#allocation5 + $0x80] sm:$0xf]  ;;  %v2834_v31 = vor.u32 %v4177_v18, %v2833_v17 }
  0x33   :  { %1915 = vmatpush.bf16.msra.mxu1 %v2922_v57  ;;  %v4193_v22 = vld [vmem:[#allocation5 + $0x84] sm:$0xf0]  ;;  %v2961_v23 = vld [vmem:[#allocation5 + $0x100] sm:$0xf]  ;;  %v3034_v24 = vor.u32 %v4227_v15, %v3033_v14  ;;  %v3145_v28 = vld [vmem:[#allocation5 + $0x270] sm:$0xf] }
  0x34   :  { %1928 = vmatpush.bf16.msra.mxu2 %v2986_v58  ;;  %v4209_v25 = vld [vmem:[#allocation5 + $0x104] sm:$0xf0]  ;;  %v3025_v26 = vld [vmem:[#allocation5 + $0x180] sm:$0xf]  ;;  %v4255_v29 = vld [vmem:[#allocation5 + $0x274] sm:$0xf0]  ;;  %v2898_v35 = vor.u32 %v4193_v22, %v2897_v21 }
  0x35   :  { %1941 = vmatpush.bf16.msra.mxu3 %v3050_v62  ;;  %v4225_v27 = vld [vmem:[#allocation5 + $0x184] sm:$0xf0]  ;;  %v3209_v30 = vld [vmem:[#allocation5 + $0x2f0] sm:$0xf]  ;;  %v4271_v32 = vld [vmem:[#allocation5 + $0x2f4] sm:$0xf0]  ;;  %v2962_v36 = vor.u32 %v4209_v25, %v2961_v23  ;;  %v3146_v40 = vor.u32 %v4255_v29, %v3145_v28 }
  0x36   :  { %1903 = vmatpush.bf16.msra.mxu0 %v2850_v4  ;;  %v3273_v33 = vld [vmem:[#allocation5 + $0x370] sm:$0xf]  ;;  %v4287_v34 = vld [vmem:[#allocation5 + $0x374] sm:$0xf0]  ;;  %v3026_v39 = vor.u32 %v4225_v27, %v3025_v26  ;;  %v3210_v41 = vor.u32 %v4271_v32, %v3209_v30  ;;  %v3137_v43 = vld [vmem:[#allocation5 + $0x260] sm:$0xf] }
  0x37   :  { %1916 = vmatpush.bf16.msra.mxu1 %v2914_v5  ;;  %v3337_v37 = vld [vmem:[#allocation5 + $0x3f0] sm:$0xf]  ;;  %v4303_v38 = vld [vmem:[#allocation5 + $0x3f4] sm:$0xf0]  ;;  %v3274_v42 = vor.u32 %v4287_v34, %v3273_v33  ;;  %v4253_v44 = vld [vmem:[#allocation5 + $0x264] sm:$0xf0] }
  0x38   :  { %1929 = vmatpush.bf16.msra.mxu2 %v2978_v6  ;;  %v3201_v45 = vld [vmem:[#allocation5 + $0x2e0] sm:$0xf]  ;;  %v3338_v46 = vor.u32 %v4303_v38, %v3337_v37  ;;  %v4269_v47 = vld [vmem:[#allocation5 + $0x2e4] sm:$0xf0]  ;;  %v3138_v52 = vor.u32 %v4253_v44, %v3137_v43  ;;  %v3129_v53 = vld [vmem:[#allocation5 + $0x250] sm:$0xf] }
  0x39   :  { %1942 = vmatpush.bf16.msra.mxu3 %v3042_v10  ;;  %v3265_v48 = vld [vmem:[#allocation5 + $0x360] sm:$0xf]  ;;  %v4285_v49 = vld [vmem:[#allocation5 + $0x364] sm:$0xf0]  ;;  %v3202_v54 = vor.u32 %v4269_v47, %v3201_v45  ;;  %v4251_v56 = vld [vmem:[#allocation5 + $0x254] sm:$0xf0] }
  0x3a   :  { %1904 = vmatpush.bf16.msra.mxu0 %v2842_v16  ;;  %v3329_v50 = vld [vmem:[#allocation5 + $0x3e0] sm:$0xf]  ;;  %v4301_v51 = vld [vmem:[#allocation5 + $0x3e4] sm:$0xf0]  ;;  %v3266_v55 = vor.u32 %v4285_v49, %v3265_v48  ;;  %v3193_v57 = vld [vmem:[#allocation5 + $0x2d0] sm:$0xf]  ;;  %v3130_v0 = vor.u32 %v4251_v56, %v3129_v53 }
  0x3b   :  { %1917 = vmatpush.bf16.msra.mxu1 %v2906_v19  ;;  %v4267_v58 = vld [vmem:[#allocation5 + $0x2d4] sm:$0xf0]  ;;  %v3330_v59 = vor.u32 %v4301_v51, %v3329_v50  ;;  %v3257_v60 = vld [vmem:[#allocation5 + $0x350] sm:$0xf]  ;;  %v3121_v2 = vld [vmem:[#allocation5 + $0x240] sm:$0xf] }
  0x3c   :  { %1930 = vmatpush.bf16.msra.mxu2 %v2970_v20  ;;  %v4283_v61 = vld [vmem:[#allocation5 + $0x354] sm:$0xf0]  ;;  %v3321_v62 = vld [vmem:[#allocation5 + $0x3d0] sm:$0xf]  ;;  %v3194_v1 = vor.u32 %v4267_v58, %v3193_v57  ;;  %v130_v3 = vld [vmem:[#allocation2 + $0x10] sm:$0xff]  ;;  %s4743_s4 = smov [#allocation14]  }
  0x3d   :  { %1943 = vmatpush.bf16.msra.mxu3 %v3034_v24  ;;  %v4299_v63 = vld [vmem:[#allocation5 + $0x3d4] sm:$0xf0]  ;;  %v128_v4 = vld [vmem:[#allocation2] sm:$0xff]  ;;  %v3258_v5 = vor.u32 %v4283_v61, %v3257_v60  ;;  %v4249_v6 = vld [vmem:[#allocation5 + $0x244] sm:$0xf0]  ;;  %v4805_v8 = vpack.c.bf16 %v130_v3, %v130_v3  ;;  %s2816_s6 = sshll.u32 %s4743_s4, 4  ;;  %s2817_s6 = int_to_ptr.vmem [resolvable:$true] %s2816_s6 }
  0x3e   :  { %1905 = vmatpush.bf16.msra.mxu0 %v2834_v31  ;;  %v3185_v7 = vld [vmem:[#allocation5 + $0x2c0] sm:$0xf]  ;;  %v4807_v9 = vpack.c.bf16 %v128_v4, %v128_v4  ;;  %v131_v10 = vld [vmem:[#allocation2 + $0x18] sm:$0xff]  ;;  %v3322_v11 = vor.u32 %v4299_v63, %v3321_v62  ;;  %v3122_v18 = vor.u32 %v4249_v6, %v3121_v2  ;;  %v129_v19 = vld [vmem:[#allocation2 + $0x8] sm:$0xff]  ;;  %s2818_s14 = sshll.u32 %s4932_s7, 4  ;;  %s2819_s14 = int_to_ptr.hbm [resolvable:$true] %s2818_s14 }
  0x3f   :  { %1918 = vmatpush.bf16.msra.mxu1 %v2898_v35  ;;  %v4265_v12 = vld [vmem:[#allocation5 + $0x2c4] sm:$0xf0]  ;;  %v3249_v13 = vld [vmem:[#allocation5 + $0x340] sm:$0xf]  ;;  %v4809_v15 = vpack.c.bf16 %v131_v10, %v131_v10  ;;  %v3113_v22 = vld [vmem:[#allocation5 + $0x230] sm:$0xf]  ;;  %v4814_v25 = vpack.c.bf16 %v129_v19, %v129_v19 }
  0x40   :  { %1931 = vmatpush.bf16.msra.mxu2 %v2962_v36  ;;  %v4281_v14 = vld [vmem:[#allocation5 + $0x344] sm:$0xf0]  ;;  %v3313_v16 = vld [vmem:[#allocation5 + $0x3c0] sm:$0xf]  ;;  %v3186_v20 = vor.u32 %v4265_v12, %v3185_v7  ;;  %v4247_v23 = vld [vmem:[#allocation5 + $0x234] sm:$0xf0] }
  0x41   :  { %1944 = vmatpush.bf16.msra.mxu3 %v3026_v39  ;;  %v4297_v17 = vld [vmem:[#allocation5 + $0x3c4] sm:$0xf0]  ;;  %1906 = vmatmul.bf16.vlgmr.msra.gmra.mxu0 %v4807_v9  ;;  %v3250_v21 = vor.u32 %v4281_v14, %v3249_v13  ;;  %v3177_v24 = vld [vmem:[#allocation5 + $0x2b0] sm:$0xf]  ;;  %v4263_v27 = vld [vmem:[#allocation5 + $0x2b4] sm:$0xf0]  ;;  %v3114_v32 = vor.u32 %v4247_v23, %v3113_v22 }
  0x42   :  { %1950 = vmatpush.bf16.msrb.mxu0 %v3146_v40  ;;  %v3314_v26 = vor.u32 %v4297_v17, %v3313_v16  ;;  %v3241_v28 = vld [vmem:[#allocation5 + $0x330] sm:$0xf]  ;;  %v4279_v29 = vld [vmem:[#allocation5 + $0x334] sm:$0xf0]  ;;  %1919 = vmatmul.bf16.vlgmr.msra.gmra.mxu1 %v4814_v25  ;;  %v3178_v33 = vor.u32 %v4263_v27, %v3177_v24  ;;  %v3105_v35 = vld [vmem:[#allocation5 + $0x220] sm:$0xf] }
  0x43   :  { %1963 = vmatpush.bf16.msrb.mxu1 %v3210_v41  ;;  %1932 = vmatmul.bf16.vlgmr.msra.gmra.mxu2 %v4805_v8  ;;  %v3305_v30 = vld [vmem:[#allocation5 + $0x3b0] sm:$0xf]  ;;  %v4295_v31 = vld [vmem:[#allocation5 + $0x3b4] sm:$0xf0]  ;;  %v3242_v34 = vor.u32 %v4279_v29, %v3241_v28  ;;  %v4245_v36 = vld [vmem:[#allocation5 + $0x224] sm:$0xf0] }
  0x44   :  { %1976 = vmatpush.bf16.msrb.mxu2 %v3274_v42  ;;  %1945 = vmatmul.bf16.vlgmr.msra.gmra.mxu3 %v4809_v15  ;;  %v3169_v37 = vld [vmem:[#allocation5 + $0x2a0] sm:$0xf]  ;;  %v3306_v38 = vor.u32 %v4295_v31, %v3305_v30  ;;  %v4261_v39 = vld [vmem:[#allocation5 + $0x2a4] sm:$0xf0]  ;;  %v3106_v44 = vor.u32 %v4245_v36, %v3105_v35  ;;  %v3097_v47 = vld [vmem:[#allocation5 + $0x210] sm:$0xf] }
  0x45   :  { %1989 = vmatpush.bf16.msrb.mxu3 %v3338_v46  ;;  %v3233_v40 = vld [vmem:[#allocation5 + $0x320] sm:$0xf]  ;;  %v4277_v41 = vld [vmem:[#allocation5 + $0x324] sm:$0xf0]  ;;  %v3170_v45 = vor.u32 %v4261_v39, %v3169_v37  ;;  %v4243_v48 = vld [vmem:[#allocation5 + $0x214] sm:$0xf0] }
  0x46   :  { %1951 = vmatpush.bf16.msrb.mxu0 %v3138_v52  ;;  %v3297_v42 = vld [vmem:[#allocation5 + $0x3a0] sm:$0xf]  ;;  %v4293_v43 = vld [vmem:[#allocation5 + $0x3a4] sm:$0xf0]  ;;  %v3234_v46 = vor.u32 %v4277_v41, %v3233_v40  ;;  %v3161_v49 = vld [vmem:[#allocation5 + $0x290] sm:$0xf]  ;;  %v3098_v56 = vor.u32 %v4243_v48, %v3097_v47 }
  0x47   :  { %1964 = vmatpush.bf16.msrb.mxu1 %v3202_v54  ;;  %v3298_v50 = vor.u32 %v4293_v43, %v3297_v42  ;;  %v4259_v51 = vld [vmem:[#allocation5 + $0x294] sm:$0xf0]  ;;  %v3225_v52 = vld [vmem:[#allocation5 + $0x310] sm:$0xf]  ;;  %v3089_v57 = vld [vmem:[#allocation5 + $0x200] sm:$0xf] }
  0x48   :  { %1977 = vmatpush.bf16.msrb.mxu2 %v3266_v55  ;;  %v4275_v53 = vld [vmem:[#allocation5 + $0x314] sm:$0xf0]  ;;  %v3289_v54 = vld [vmem:[#allocation5 + $0x390] sm:$0xf]  ;;  %v4241_v58 = vld [vmem:[#allocation5 + $0x204] sm:$0xf0] }
  0x49   :  { %1990 = vmatpush.bf16.msrb.mxu3 %v3330_v59  ;;  %v4291_v55 = vld [vmem:[#allocation5 + $0x394] sm:$0xf0]  ;;  %v3162_v59 = vor.u32 %v4259_v51, %v3161_v49  ;;  %v3226_v60 = vor.u32 %v4275_v53, %v3225_v52  ;;  %v3153_v61 = vld [vmem:[#allocation5 + $0x280] sm:$0xf]  ;;  %v4257_v62 = vld [vmem:[#allocation5 + $0x284] sm:$0xf0]  ;;  %v3090_v7 = vor.u32 %v4241_v58, %v3089_v57 }
  0x4a   :  { %1952 = vmatpush.bf16.msrb.mxu0 %v3130_v0  ;;  %v3217_v63 = vld [vmem:[#allocation5 + $0x300] sm:$0xf]  ;;  %v3290_v0 = vor.u32 %v4291_v55, %v3289_v54  ;;  %v4289_v3 = vld [vmem:[#allocation5 + $0x384] sm:$0xf0]  ;;  %v3401_v4 = vld [vmem:[#allocation5 + $0x470] sm:$0xf]  ;;  %v3154_v13 = vor.u32 %v4257_v62, %v3153_v61 }
  0x4b   :  { %1965 = vmatpush.bf16.msrb.mxu1 %v3194_v1  ;;  %v4273_v1 = vld [vmem:[#allocation5 + $0x304] sm:$0xf0]  ;;  %v3281_v2 = vld [vmem:[#allocation5 + $0x380] sm:$0xf]  ;;  %v3465_v6 = vld [vmem:[#allocation5 + $0x4f0] sm:$0xf] }
  0x4c   :  { %1978 = vmatpush.bf16.msrb.mxu2 %v3258_v5  ;;  %v4319_v5 = vld [vmem:[#allocation5 + $0x474] sm:$0xf0]  ;;  %v3218_v14 = vor.u32 %v4273_v1, %v3217_v63  ;;  %v3593_v16 = vld [vmem:[#allocation5 + $0x5f0] sm:$0xf]  ;;  %v3282_v19 = vor.u32 %v4289_v3, %v3281_v2  ;;  %v135_v23 = vld [vmem:[#allocation2 + $0x38] sm:$0xff] }
  0x4d   :  { %1991 = vmatpush.bf16.msrb.mxu3 %v3322_v11  ;;  %v4335_v10 = vld [vmem:[#allocation5 + $0x4f4] sm:$0xf0]  ;;  %v3529_v11 = vld [vmem:[#allocation5 + $0x570] sm:$0xf]  ;;  %v4317_v27 = vld [vmem:[#allocation5 + $0x464] sm:$0xf0] }
  0x4e   :  { %1953 = vmatpush.bf16.msrb.mxu0 %v3122_v18  ;;  %v4351_v12 = vld [vmem:[#allocation5 + $0x574] sm:$0xf0]  ;;  %v134_v18 = vld [vmem:[#allocation2 + $0x30] sm:$0xff]  ;;  %v132_v22 = vld [vmem:[#allocation2 + $0x20] sm:$0xff]  ;;  %v3466_v24 = vor.u32 %v4335_v10, %v3465_v6 }
  0x4f   :  { %1966 = vmatpush.bf16.msrb.mxu1 %v3186_v20  ;;  %v4367_v17 = vld [vmem:[#allocation5 + $0x5f4] sm:$0xf0]  ;;  %v3402_v20 = vor.u32 %v4319_v5, %v3401_v4  ;;  %v3457_v28 = vld [vmem:[#allocation5 + $0x4e0] sm:$0xf]  ;;  %v4333_v31 = vld [vmem:[#allocation5 + $0x4e4] sm:$0xf0]  ;;  %v4819_v37 = vpack.c.bf16 %v132_v22, %v132_v22 }
  0x50   :  { %1979 = vmatpush.bf16.msrb.mxu2 %v3250_v21  ;;  %v3393_v21 = vld [vmem:[#allocation5 + $0x460] sm:$0xf]  ;;  %v133_v29 = vld [vmem:[#allocation2 + $0x28] sm:$0xff]  ;;  %v3594_v30 = vor.u32 %v4367_v17, %v3593_v16  ;;  %v4365_v36 = vld [vmem:[#allocation5 + $0x5e4] sm:$0xf0]  ;;  %v3458_v41 = vor.u32 %v4333_v31, %v3457_v28 }
  0x51   :  { %1992 = vmatpush.bf16.msrb.mxu3 %v3314_v26  ;;  %v3530_v26 = vor.u32 %v4351_v12, %v3529_v11  ;;  %v3585_v35 = vld [vmem:[#allocation5 + $0x5e0] sm:$0xf]  ;;  %v3394_v39 = vor.u32 %v4317_v27, %v3393_v21  ;;  %v4823_v40 = vpack.c.bf16 %v133_v29, %v133_v29  ;;  %v3385_v43 = vld [vmem:[#allocation5 + $0x450] sm:$0xf]  ;;  %v4331_v47 = vld [vmem:[#allocation5 + $0x4d4] sm:$0xf0] }
  0x52   :  { %1954 = vmatpush.bf16.msrb.mxu0 %v3114_v32  ;;  %v3521_v32 = vld [vmem:[#allocation5 + $0x560] sm:$0xf]  ;;  %v3513_v48 = vld [vmem:[#allocation5 + $0x550] sm:$0xf]  ;;  %v4347_v49 = vld [vmem:[#allocation5 + $0x554] sm:$0xf0] }
  0x53   :  { %1967 = vmatpush.bf16.msrb.mxu1 %v3178_v33  ;;  %v4349_v33 = vld [vmem:[#allocation5 + $0x564] sm:$0xf0]  ;;  %v4363_v51 = vld [vmem:[#allocation5 + $0x5d4] sm:$0xf0]  ;;  %v3514_v54 = vor.u32 %v4347_v49, %v3513_v48  ;;  %v3377_v55 = vld [vmem:[#allocation5 + $0x440] sm:$0xf] }
  0x54   :  { %1980 = vmatpush.bf16.msrb.mxu2 %v3242_v34  ;;  %v4817_v34 = vpack.c.bf16 %v134_v18, %v134_v18  ;;  %v3522_v42 = vor.u32 %v4349_v33, %v3521_v32  ;;  %v3441_v57 = vld [vmem:[#allocation5 + $0x4c0] sm:$0xf]  ;;  %v4345_v61 = vld [vmem:[#allocation5 + $0x544] sm:$0xf0]  ;;  %v3369_v3 = vld [vmem:[#allocation5 + $0x430] sm:$0xf] }
  0x55   :  { %1993 = vmatpush.bf16.msrb.mxu3 %v3306_v38  ;;  %v4821_v38 = vpack.c.bf16 %v135_v23, %v135_v23  ;;  %v3569_v62 = vld [vmem:[#allocation5 + $0x5c0] sm:$0xf]  ;;  %v4361_v63 = vld [vmem:[#allocation5 + $0x5c4] sm:$0xf0]  ;;  %v4311_v4 = vld [vmem:[#allocation5 + $0x434] sm:$0xf0] }
  0x56   :  { %1955 = vmatpush.bf16.msrb.mxu0 %v3106_v44  ;;  %v4315_v44 = vld [vmem:[#allocation5 + $0x454] sm:$0xf0]  ;;  %v3433_v5 = vld [vmem:[#allocation5 + $0x4b0] sm:$0xf]  ;;  %v3570_v6 = vor.u32 %v4361_v63, %v3569_v62  ;;  %v3361_v18 = vld [vmem:[#allocation5 + $0x420] sm:$0xf] }
  0x57   :  { %1968 = vmatpush.bf16.msrb.mxu1 %v3170_v45  ;;  %v3449_v45 = vld [vmem:[#allocation5 + $0x4d0] sm:$0xf]  ;;  %v3386_v52 = vor.u32 %v4315_v44, %v3385_v43  ;;  %v4343_v11 = vld [vmem:[#allocation5 + $0x534] sm:$0xf0]  ;;  %v4325_v22 = vld [vmem:[#allocation5 + $0x4a4] sm:$0xf0] }
  0x58   :  { %1981 = vmatpush.bf16.msrb.mxu2 %v3234_v46  ;;  %v3586_v46 = vor.u32 %v4365_v36, %v3585_v35  ;;  %v3450_v53 = vor.u32 %v4331_v47, %v3449_v45  ;;  %v3497_v10 = vld [vmem:[#allocation5 + $0x530] sm:$0xf]  ;;  %v3489_v23 = vld [vmem:[#allocation5 + $0x520] sm:$0xf]  ;;  %v4357_v27 = vld [vmem:[#allocation5 + $0x5a4] sm:$0xf0] }
  0x59   :  { %1994 = vmatpush.bf16.msrb.mxu3 %v3298_v50  ;;  %v3577_v50 = vld [vmem:[#allocation5 + $0x5d0] sm:$0xf]  ;;  %v3498_v17 = vor.u32 %v4343_v11, %v3497_v10  ;;  %v4307_v32 = vld [vmem:[#allocation5 + $0x414] sm:$0xf0]  ;;  %v3345_v45 = vld [vmem:[#allocation5 + $0x400] sm:$0xf] }
  0x5a   :  { %1956 = vmatpush.bf16.msrb.mxu0 %v3098_v56  ;;  %v4313_v56 = vld [vmem:[#allocation5 + $0x444] sm:$0xf0]  ;;  %v3578_v58 = vor.u32 %v4363_v51, %v3577_v50  ;;  %v3561_v12 = vld [vmem:[#allocation5 + $0x5b0] sm:$0xf]  ;;  %v4323_v36 = vld [vmem:[#allocation5 + $0x494] sm:$0xf0] }
  0x5b   :  { %1969 = vmatpush.bf16.msrb.mxu1 %v3162_v59  ;;  %v4329_v59 = vld [vmem:[#allocation5 + $0x4c4] sm:$0xf0]  ;;  %v3353_v31 = vld [vmem:[#allocation5 + $0x410] sm:$0xf]  ;;  %v4355_v43 = vld [vmem:[#allocation5 + $0x594] sm:$0xf0] }
  0x5c   :  { %1982 = vmatpush.bf16.msrb.mxu2 %v3226_v60  ;;  %v3505_v60 = vld [vmem:[#allocation5 + $0x540] sm:$0xf]  ;;  %v3442_v1 = vor.u32 %v4329_v59, %v3441_v57  ;;  %v3417_v33 = vld [vmem:[#allocation5 + $0x490] sm:$0xf]  ;;  %v3354_v44 = vor.u32 %v4307_v32, %v3353_v31  ;;  %v4321_v50 = vld [vmem:[#allocation5 + $0x484] sm:$0xf0] }
  0x5d   :  { %1995 = vmatpush.bf16.msrb.mxu3 %v3290_v0  ;;  %v3378_v0 = vor.u32 %v4313_v56, %v3377_v55  ;;  %v3506_v2 = vor.u32 %v4345_v61, %v3505_v60  ;;  %v3409_v47 = vld [vmem:[#allocation5 + $0x480] sm:$0xf]  ;;  %v3418_v48 = vor.u32 %v4323_v36, %v3417_v33  ;;  %v4353_v55 = vld [vmem:[#allocation5 + $0x584] sm:$0xf0]  ;;  %v3657_v56 = vld [vmem:[#allocation5 + $0x670] sm:$0xf] }
  0x5e   :  { %1957 = vmatpush.bf16.msrb.mxu0 %v3090_v7  ;;  %v4327_v7 = vld [vmem:[#allocation5 + $0x4b4] sm:$0xf0]  ;;  %v3473_v51 = vld [vmem:[#allocation5 + $0x500] sm:$0xf]  ;;  %v3785_v61 = vld [vmem:[#allocation5 + $0x770] sm:$0xf]  ;;  %v3410_v63 = vor.u32 %v4321_v50, %v3409_v47 }
  0x5f   :  { %1970 = vmatpush.bf16.msrb.mxu1 %v3154_v13  ;;  %v4359_v13 = vld [vmem:[#allocation5 + $0x5b4] sm:$0xf0]  ;;  %v3434_v16 = vor.u32 %v4327_v7, %v3433_v5  ;;  %v139_v10 = vld [vmem:[#allocation2 + $0x58] sm:$0xff]  ;;  %v3641_v31 = vld [vmem:[#allocation5 + $0x650] sm:$0xf] }
  0x60   :  { %1983 = vmatpush.bf16.msrb.mxu2 %v3218_v14  ;;  %v3370_v14 = vor.u32 %v4311_v4, %v3369_v3  ;;  %v3562_v21 = vor.u32 %v4359_v13, %v3561_v12  ;;  %v4383_v57 = vld [vmem:[#allocation5 + $0x674] sm:$0xf0]  ;;  %v136_v3 = vld [vmem:[#allocation2 + $0x40] sm:$0xff]  ;;  %v3649_v13 = vld [vmem:[#allocation5 + $0x660] sm:$0xf] }
  0x61   :  { %1996 = vmatpush.bf16.msrb.mxu3 %v3282_v19  ;;  %1958 = vmatmul.bf16.vlgmr.msrb.gmra.mxu0 %v4819_v37  ;;  %v4309_v19 = vld [vmem:[#allocation5 + $0x424] sm:$0xf0]  ;;  %v4399_v60 = vld [vmem:[#allocation5 + $0x6f4] sm:$0xf0]  ;;  %v3658_v5 = vor.u32 %v4383_v57, %v3657_v56  ;;  %v3705_v33 = vld [vmem:[#allocation5 + $0x6d0] sm:$0xf] }
  0x62   :  { %2002 = vmatpush.bf16.msra.mxu0 %v3402_v20  ;;  %1971 = vmatmul.bf16.vlgmr.msrb.gmra.mxu1 %v4823_v40  ;;  %v3425_v20 = vld [vmem:[#allocation5 + $0x4a0] sm:$0xf]  ;;  %v3362_v28 = vor.u32 %v4309_v19, %v3361_v18  ;;  %v4415_v62 = vld [vmem:[#allocation5 + $0x774] sm:$0xf0]  ;;  %v4829_v18 = vpack.c.bf16 %v136_v3, %v136_v3  ;;  %v4397_v19 = vld [vmem:[#allocation5 + $0x6e4] sm:$0xf0] }
  0x63   :  { %2015 = vmatpush.bf16.msra.mxu1 %v3466_v24  ;;  %1984 = vmatmul.bf16.vlgmr.msrb.gmra.mxu2 %v4817_v34  ;;  %v4341_v24 = vld [vmem:[#allocation5 + $0x524] sm:$0xf0]  ;;  %v3426_v29 = vor.u32 %v4325_v22, %v3425_v20  ;;  %v137_v7 = vld [vmem:[#allocation2 + $0x48] sm:$0xff]  ;;  %v3786_v12 = vor.u32 %v4415_v62, %v3785_v61  ;;  %v3777_v20 = vld [vmem:[#allocation5 + $0x760] sm:$0xf] }
  0x64   :  { %2028 = vmatpush.bf16.msra.mxu2 %v3530_v26  ;;  %1997 = vmatmul.bf16.vlgmr.msrb.gmra.mxu3 %v4821_v38  ;;  %v3553_v26 = vld [vmem:[#allocation5 + $0x5a0] sm:$0xf]  ;;  %v4379_v32 = vld [vmem:[#allocation5 + $0x654] sm:$0xf0]  ;;  %v3689_v61 = vld [vmem:[#allocation5 + $0x6b0] sm:$0xf] }
  0x65   :  { %2041 = vmatpush.bf16.msra.mxu3 %v3594_v30  ;;  %v3490_v30 = vor.u32 %v4341_v24, %v3489_v23  ;;  %v3554_v35 = vor.u32 %v4357_v27, %v3553_v26  ;;  %v4833_v23 = vpack.c.bf16 %v137_v7, %v137_v7  ;;  %v3841_v24 = vld [vmem:[#allocation5 + $0x7e0] sm:$0xf]  ;;  %v4429_v26 = vld [vmem:[#allocation5 + $0x7e4] sm:$0xf0]  ;;  %v4835_v27 = vpack.c.bf16 %v139_v10, %v139_v10  ;;  %v4395_v36 = vld [vmem:[#allocation5 + $0x6d4] sm:$0xf0] }
  0x66   :  { %2003 = vmatpush.bf16.msra.mxu0 %v3394_v39  ;;  %v3481_v39 = vld [vmem:[#allocation5 + $0x510] sm:$0xf]  ;;  %v3633_v47 = vld [vmem:[#allocation5 + $0x640] sm:$0xf]  ;;  %v4423_v3 = vld [vmem:[#allocation5 + $0x7b4] sm:$0xf0] }
  0x67   :  { %2016 = vmatpush.bf16.msra.mxu1 %v3458_v41  ;;  %v4339_v41 = vld [vmem:[#allocation5 + $0x514] sm:$0xf0]  ;;  %v3617_v7 = vld [vmem:[#allocation5 + $0x620] sm:$0xf]  ;;  %v4373_v10 = vld [vmem:[#allocation5 + $0x624] sm:$0xf0] }
  0x68   :  { %2029 = vmatpush.bf16.msra.mxu2 %v3522_v42  ;;  %v3545_v42 = vld [vmem:[#allocation5 + $0x590] sm:$0xf]  ;;  %v3482_v49 = vor.u32 %v4339_v41, %v3481_v39  ;;  %v4411_v41 = vld [vmem:[#allocation5 + $0x754] sm:$0xf0] }
  0x69   :  { %2042 = vmatpush.bf16.msra.mxu3 %v3586_v46  ;;  %v4305_v46 = vld [vmem:[#allocation5 + $0x404] sm:$0xf0]  ;;  %v3769_v39 = vld [vmem:[#allocation5 + $0x750] sm:$0xf] }
  0x6a   :  { %2004 = vmatpush.bf16.msra.mxu0 %v3386_v52  ;;  %v4337_v52 = vld [vmem:[#allocation5 + $0x504] sm:$0xf0]  ;;  %v3346_v59 = vor.u32 %v4305_v46, %v3345_v45  ;;  %v3706_v45 = vor.u32 %v4395_v36, %v3705_v33  ;;  %v3770_v46 = vor.u32 %v4411_v41, %v3769_v39  ;;  %v4403_v33 = vld [vmem:[#allocation5 + $0x714] sm:$0xf0]  ;;  %v3601_v41 = vld [vmem:[#allocation5 + $0x600] sm:$0xf] }
  0x6b   :  { %2017 = vmatpush.bf16.msra.mxu1 %v3450_v53  ;;  %v3546_v53 = vor.u32 %v4355_v43, %v3545_v42  ;;  %v3833_v42 = vld [vmem:[#allocation5 + $0x7d0] sm:$0xf]  ;;  %v4427_v43 = vld [vmem:[#allocation5 + $0x7d4] sm:$0xf0] }
  0x6c   :  { %2030 = vmatpush.bf16.msra.mxu2 %v3514_v54  ;;  %v3537_v54 = vld [vmem:[#allocation5 + $0x580] sm:$0xf]  ;;  %v3834_v50 = vor.u32 %v4427_v43, %v3833_v42  ;;  %v4419_v36 = vld [vmem:[#allocation5 + $0x794] sm:$0xf0]  ;;  %v4369_v42 = vld [vmem:[#allocation5 + $0x604] sm:$0xf0] }
  0x6d   :  { %2043 = vmatpush.bf16.msra.mxu3 %v3578_v58  ;;  %v3721_v58 = vld [vmem:[#allocation5 + $0x6f0] sm:$0xf]  ;;  %v3538_v4 = vor.u32 %v4353_v55, %v3537_v54  ;;  %v3825_v54 = vld [vmem:[#allocation5 + $0x7c0] sm:$0xf]  ;;  %v4425_v55 = vld [vmem:[#allocation5 + $0x7c4] sm:$0xf0] }
  0x6e   :  { %2005 = vmatpush.bf16.msra.mxu0 %v3378_v0  ;;  %v3474_v0 = vor.u32 %v4337_v52, %v3473_v51  ;;  %v3722_v11 = vor.u32 %v4399_v60, %v3721_v58  ;;  %v4393_v51 = vld [vmem:[#allocation5 + $0x6c4] sm:$0xf0]  ;;  %v3761_v52 = vld [vmem:[#allocation5 + $0x740] sm:$0xf]  ;;  %v4375_v60 = vld [vmem:[#allocation5 + $0x634] sm:$0xf0]  ;;  %v3826_v62 = vor.u32 %v4425_v55, %v3825_v54  ;;  %v3602_v55 = vor.u32 %v4369_v42, %v3601_v41 }
  0x6f   :  { %2018 = vmatpush.bf16.msra.mxu1 %v3442_v1  ;;  %v3849_v1 = vld [vmem:[#allocation5 + $0x7f0] sm:$0xf]  ;;  %v2875_v41 = vld [vmem:[#allocation5 + $0x58] sm:$0xf0]  ;;  %v4202_v42 = vld [vmem:[#allocation5 + $0xd4] sm:$0xf] }
  0x70   :  { %2031 = vmatpush.bf16.msra.mxu2 %v3506_v2  ;;  %v4431_v2 = vld [vmem:[#allocation5 + $0x7f4] sm:$0xf0]  ;;  %v3977_v54 = vld [vmem:[#allocation5 + $0x8f0] sm:$0xf] }
  0x71   :  { %2044 = vmatpush.bf16.msra.mxu3 %v3570_v6  ;;  %v138_v6 = vld [vmem:[#allocation2 + $0x50] sm:$0xff] }
  0x72   :  { %2006 = vmatpush.bf16.msra.mxu0 %v3370_v14  ;;  %v4381_v14 = vld [vmem:[#allocation5 + $0x664] sm:$0xf0]  ;;  %v4831_v22 = vpack.c.bf16 %v138_v6, %v138_v6 }
  0x73   :  { %2019 = vmatpush.bf16.msra.mxu1 %v3434_v16  ;;  %v3713_v16 = vld [vmem:[#allocation5 + $0x6e0] sm:$0xf] }
  0x74   :  { %2032 = vmatpush.bf16.msra.mxu2 %v3498_v17  ;;  %v3850_v17 = vor.u32 %v4431_v2, %v3849_v1  ;;  %v4407_v1 = vld [vmem:[#allocation5 + $0x734] sm:$0xf0]  ;;  %v3817_v2 = vld [vmem:[#allocation5 + $0x7b0] sm:$0xf] }
  0x75   :  { %2045 = vmatpush.bf16.msra.mxu3 %v3562_v21  ;;  %v4413_v21 = vld [vmem:[#allocation5 + $0x764] sm:$0xf0] }
  0x76   :  { %2007 = vmatpush.bf16.msra.mxu0 %v3362_v28  ;;  %v3650_v28 = vor.u32 %v4381_v14, %v3649_v13  ;;  %v4389_v13 = vld [vmem:[#allocation5 + $0x6a4] sm:$0xf0]  ;;  %v3745_v14 = vld [vmem:[#allocation5 + $0x720] sm:$0xf] }
  0x77   :  { %2020 = vmatpush.bf16.msra.mxu1 %v3426_v29  ;;  %v3714_v29 = vor.u32 %v4397_v19, %v3713_v16  ;;  %v4405_v16 = vld [vmem:[#allocation5 + $0x724] sm:$0xf0] }
  0x78   :  { %2033 = vmatpush.bf16.msra.mxu2 %v3490_v30  ;;  %v3778_v30 = vor.u32 %v4413_v21, %v3777_v20  ;;  %v4421_v19 = vld [vmem:[#allocation5 + $0x7a4] sm:$0xf0]  ;;  %v3618_v20 = vor.u32 %v4373_v10, %v3617_v7  ;;  %v3905_v7 = vld [vmem:[#allocation5 + $0x860] sm:$0xf] }
  0x79   :  { %2046 = vmatpush.bf16.msra.mxu3 %v3554_v35  ;;  %v3842_v35 = vor.u32 %v4429_v26, %v3841_v24  ;;  %v3746_v24 = vor.u32 %v4405_v16, %v3745_v14  ;;  %v3609_v26 = vld [vmem:[#allocation5 + $0x610] sm:$0xf]  ;;  %v4445_v10 = vld [vmem:[#allocation5 + $0x864] sm:$0xf0]  ;;  %v4188_v16 = vld [vmem:[#allocation5 + $0x64] sm:$0xf] }
  0x7a   :  { %2008 = vmatpush.bf16.msra.mxu0 %v3354_v44  ;;  %v3642_v44 = vor.u32 %v4379_v32, %v3641_v31  ;;  %v4387_v31 = vld [vmem:[#allocation5 + $0x694] sm:$0xf0]  ;;  %v3737_v32 = vld [vmem:[#allocation5 + $0x710] sm:$0xf]  ;;  %v4461_v14 = vld [vmem:[#allocation5 + $0x8e4] sm:$0xf0] }
  0x7b   :  { %2021 = vmatpush.bf16.msra.mxu1 %v3418_v48  ;;  %v4377_v48 = vld [vmem:[#allocation5 + $0x644] sm:$0xf0] }
  0x7c   :  { %2034 = vmatpush.bf16.msra.mxu2 %v3482_v49  ;;  %v3697_v49 = vld [vmem:[#allocation5 + $0x6c0] sm:$0xf]  ;;  %v3634_v56 = vor.u32 %v4377_v48, %v3633_v47 }
  0x7d   :  { %2047 = vmatpush.bf16.msra.mxu3 %v3546_v53  ;;  %v4409_v53 = vld [vmem:[#allocation5 + $0x744] sm:$0xf0]  ;;  %v3698_v57 = vor.u32 %v4393_v51, %v3697_v49  ;;  %v3729_v47 = vld [vmem:[#allocation5 + $0x700] sm:$0xf] }
  0x7e   :  { %2009 = vmatpush.bf16.msra.mxu0 %v3346_v59  ;;  %v3762_v58 = vor.u32 %v4409_v53, %v3761_v52  ;;  %v3625_v59 = vld [vmem:[#allocation5 + $0x630] sm:$0xf]  ;;  %v4401_v49 = vld [vmem:[#allocation5 + $0x704] sm:$0xf0]  ;;  %v4447_v53 = vld [vmem:[#allocation5 + $0x874] sm:$0xf0] }
  0x7f   :  { %2022 = vmatpush.bf16.msra.mxu1 %v3410_v63  ;;  %v4391_v63 = vld [vmem:[#allocation5 + $0x6b4] sm:$0xf0]  ;;  %v4417_v51 = vld [vmem:[#allocation5 + $0x784] sm:$0xf0]  ;;  %v3913_v52 = vld [vmem:[#allocation5 + $0x870] sm:$0xf] }
  0x80   :  { %2035 = vmatpush.bf16.msra.mxu2 %v3474_v0  ;;  %v3753_v0 = vld [vmem:[#allocation5 + $0x730] sm:$0xf] }
  0x81   :  { %2048 = vmatpush.bf16.msra.mxu3 %v3538_v4  ;;  %2010 = vmatmul.bf16.vlgmr.msra.gmra.mxu0 %v4829_v18  ;;  %v3626_v4 = vor.u32 %v4375_v60, %v3625_v59  ;;  %v3754_v6 = vor.u32 %v4407_v1, %v3753_v0  ;;  %v3730_v60 = vor.u32 %v4401_v49, %v3729_v47  ;;  %v3889_v47 = vld [vmem:[#allocation5 + $0x840] sm:$0xf] }
  0x82   :  { %2054 = vmatpush.bf16.msrb.mxu0 %v3658_v5  ;;  %2023 = vmatmul.bf16.vlgmr.msra.gmra.mxu1 %v4833_v23  ;;  %v3690_v5 = vor.u32 %v4391_v63, %v3689_v61  ;;  %v4206_v61 = vld [vmem:[#allocation5 + $0xf4] sm:$0xf]  ;;  %v3914_v1 = vor.u32 %v4447_v53, %v3913_v52  ;;  %v3953_v49 = vld [vmem:[#allocation5 + $0x8c0] sm:$0xf]  ;;  %v4184_v52 = vld [vmem:[#allocation5 + $0x44] sm:$0xf] }
  0x83   :  { %2067 = vmatpush.bf16.msrb.mxu1 %v3722_v11  ;;  %2036 = vmatmul.bf16.vlgmr.msra.gmra.mxu2 %v4831_v22  ;;  %v3681_v11 = vld [vmem:[#allocation5 + $0x6a0] sm:$0xf]  ;;  %v140_v63 = vld [vmem:[#allocation2 + $0x60] sm:$0xff]  ;;  %v2867_v53 = vld [vmem:[#allocation5 + $0x48] sm:$0xf0] }
  0x84   :  { %2080 = vmatpush.bf16.msrb.mxu2 %v3786_v12  ;;  %2049 = vmatmul.bf16.vlgmr.msra.gmra.mxu3 %v4835_v27  ;;  %v3818_v12 = vor.u32 %v4423_v3, %v3817_v2  ;;  %v3682_v21 = vor.u32 %v4389_v13, %v3681_v11  ;;  %v142_v2 = vld [vmem:[#allocation2 + $0x70] sm:$0xff]  ;;  %v141_v3 = vld [vmem:[#allocation2 + $0x68] sm:$0xff]  ;;  %v4841_v13 = vpack.c.bf16 %v140_v63, %v140_v63 }
  0x85   :  { %2093 = vmatpush.bf16.msrb.mxu3 %v3850_v17  ;;  %v3809_v17 = vld [vmem:[#allocation5 + $0x7a0] sm:$0xf]  ;;  %v4455_v63 = vld [vmem:[#allocation5 + $0x8b4] sm:$0xf0] }
  0x86   :  { %2055 = vmatpush.bf16.msrb.mxu0 %v3650_v28  ;;  %v4371_v28 = vld [vmem:[#allocation5 + $0x614] sm:$0xf0]  ;;  %v3969_v11 = vld [vmem:[#allocation5 + $0x8e0] sm:$0xf] }
  0x87   :  { %2068 = vmatpush.bf16.msrb.mxu1 %v3714_v29  ;;  %v3673_v29 = vld [vmem:[#allocation5 + $0x690] sm:$0xf]  ;;  %v3610_v39 = vor.u32 %v4371_v28, %v3609_v26  ;;  %v3906_v28 = vor.u32 %v4445_v10, %v3905_v7  ;;  %v3873_v7 = vld [vmem:[#allocation5 + $0x820] sm:$0xf]  ;;  %v4437_v10 = vld [vmem:[#allocation5 + $0x824] sm:$0xf0] }
  0x88   :  { %2081 = vmatpush.bf16.msrb.mxu2 %v3778_v30  ;;  %v3810_v30 = vor.u32 %v4421_v19, %v3809_v17  ;;  %v3674_v43 = vor.u32 %v4387_v31, %v3673_v29  ;;  %v2883_v17 = vld [vmem:[#allocation5 + $0x68] sm:$0xf0]  ;;  %v4843_v19 = vpack.c.bf16 %v142_v2, %v142_v2  ;;  %v3970_v29 = vor.u32 %v4461_v14, %v3969_v11  ;;  %v3897_v31 = vld [vmem:[#allocation5 + $0x850] sm:$0xf]  ;;  %v4198_v2 = vld [vmem:[#allocation5 + $0xb4] sm:$0xf] }
  0x89   :  { %2094 = vmatpush.bf16.msrb.mxu3 %v3842_v35  ;;  %v3801_v35 = vld [vmem:[#allocation5 + $0x790] sm:$0xf]  ;;  %v3937_v11 = vld [vmem:[#allocation5 + $0x8a0] sm:$0xf]  ;;  %v4453_v14 = vld [vmem:[#allocation5 + $0x8a4] sm:$0xf0] }
  0x8a   :  { %2056 = vmatpush.bf16.msrb.mxu0 %v3642_v44  ;;  %v3738_v44 = vor.u32 %v4403_v33, %v3737_v32  ;;  %v3802_v48 = vor.u32 %v4419_v36, %v3801_v35  ;;  %v4443_v32 = vld [vmem:[#allocation5 + $0x854] sm:$0xf0]  ;;  %v3961_v33 = vld [vmem:[#allocation5 + $0x8d0] sm:$0xf] }
  0x8b   :  { %2069 = vmatpush.bf16.msrb.mxu1 %v3706_v45  ;;  %v3665_v45 = vld [vmem:[#allocation5 + $0x680] sm:$0xf]  ;;  %v4459_v36 = vld [vmem:[#allocation5 + $0x8d4] sm:$0xf0] }
  0x8c   :  { %2082 = vmatpush.bf16.msrb.mxu2 %v3770_v46  ;;  %v4385_v46 = vld [vmem:[#allocation5 + $0x684] sm:$0xf0] }
  0x8d   :  { %2095 = vmatpush.bf16.msrb.mxu3 %v3834_v50  ;;  %v3793_v50 = vld [vmem:[#allocation5 + $0x780] sm:$0xf]  ;;  %v3666_v59 = vor.u32 %v4385_v46, %v3665_v45  ;;  %v3962_v45 = vor.u32 %v4459_v36, %v3961_v33  ;;  %v3929_v33 = vld [vmem:[#allocation5 + $0x890] sm:$0xf]  ;;  %v4451_v36 = vld [vmem:[#allocation5 + $0x894] sm:$0xf0] }
  0x8e   :  { %2057 = vmatpush.bf16.msrb.mxu0 %v3634_v56  ;;  %v4463_v56 = vld [vmem:[#allocation5 + $0x8f4] sm:$0xf0]  ;;  %v3794_v0 = vor.u32 %v4417_v51, %v3793_v50  ;;  %v4457_v51 = vld [vmem:[#allocation5 + $0x8c4] sm:$0xf0] }
  0x8f   :  { %2070 = vmatpush.bf16.msrb.mxu1 %v3698_v57  ;;  %v4190_v57 = vld [vmem:[#allocation5 + $0x74] sm:$0xf] }
  0x90   :  { %2083 = vmatpush.bf16.msrb.mxu2 %v3762_v58  ;;  %v2891_v58 = vld [vmem:[#allocation5 + $0x78] sm:$0xf0] }
  0x91   :  { %2096 = vmatpush.bf16.msrb.mxu3 %v3826_v62  ;;  %v2955_v62 = vld [vmem:[#allocation5 + $0xf8] sm:$0xf0] }
  0x92   :  { %2058 = vmatpush.bf16.msrb.mxu0 %v3626_v4  ;;  %v143_v4 = vld [vmem:[#allocation2 + $0x78] sm:$0xff] }
  0x93   :  { %2071 = vmatpush.bf16.msrb.mxu1 %v3690_v5  ;;  %v3978_v5 = vor.u32 %v4463_v56, %v3977_v54  ;;  %v4847_v26 = vpack.c.bf16 %v143_v4, %v143_v4  ;;  %v4200_v54 = vld [vmem:[#allocation5 + $0xc4] sm:$0xf] }
  0x94   :  { %2084 = vmatpush.bf16.msrb.mxu2 %v3754_v6  ;;  %v2894_v6 = vor.u32 %v4190_v57, %v2891_v58  ;;  %v3954_v57 = vor.u32 %v4457_v51, %v3953_v49  ;;  %v2870_v58 = vor.u32 %v4184_v52, %v2867_v53  ;;  %v3921_v49 = vld [vmem:[#allocation5 + $0x880] sm:$0xf]  ;;  %v4176_v51 = vld [vmem:[#allocation5 + $0x4] sm:$0xf]  ;;  %v2835_v53 = vld [vmem:[#allocation5 + $0x8] sm:$0xf0] }
  0x95   :  { %2097 = vmatpush.bf16.msrb.mxu3 %v3818_v12  ;;  %v2958_v12 = vor.u32 %v4206_v61, %v2955_v62  ;;  %v3945_v61 = vld [vmem:[#allocation5 + $0x8b0] sm:$0xf] }
  0x96   :  { %2059 = vmatpush.bf16.msrb.mxu0 %v3618_v20  ;;  %v4845_v20 = vpack.c.bf16 %v141_v3, %v141_v3  ;;  %v2923_v3 = vld [vmem:[#allocation5 + $0xb8] sm:$0xf0] }
  0x97   :  { %2072 = vmatpush.bf16.msrb.mxu1 %v3682_v21  ;;  %v4204_v21 = vld [vmem:[#allocation5 + $0xe4] sm:$0xf] }
  0x98   :  { %2085 = vmatpush.bf16.msrb.mxu2 %v3746_v24  ;;  %v2947_v24 = vld [vmem:[#allocation5 + $0xe8] sm:$0xf0] }
  0x99   :  { %2098 = vmatpush.bf16.msrb.mxu3 %v3810_v30  ;;  %v2886_v30 = vor.u32 %v4188_v16, %v2883_v17  ;;  %v2950_v35 = vor.u32 %v4204_v21, %v2947_v24  ;;  %v4180_v16 = vld [vmem:[#allocation5 + $0x24] sm:$0xf]  ;;  %v2851_v17 = vld [vmem:[#allocation5 + $0x28] sm:$0xf0] }
  0x9a   :  { %2060 = vmatpush.bf16.msrb.mxu0 %v3610_v39  ;;  %v4186_v39 = vld [vmem:[#allocation5 + $0x54] sm:$0xf]  ;;  %v4196_v21 = vld [vmem:[#allocation5 + $0xa4] sm:$0xf]  ;;  %v2915_v24 = vld [vmem:[#allocation5 + $0xa8] sm:$0xf0] }
  0x9b   :  { %2073 = vmatpush.bf16.msrb.mxu1 %v3674_v43  ;;  %v2939_v43 = vld [vmem:[#allocation5 + $0xd8] sm:$0xf0]  ;;  %v2878_v46 = vor.u32 %v4186_v39, %v2875_v41  ;;  %v4178_v39 = vld [vmem:[#allocation5 + $0x14] sm:$0xf] }
  0x9c   :  { %2086 = vmatpush.bf16.msrb.mxu2 %v3738_v44  ;;  %v3898_v44 = vor.u32 %v4443_v32, %v3897_v31  ;;  %v2942_v50 = vor.u32 %v4202_v42, %v2939_v43  ;;  %v3865_v31 = vld [vmem:[#allocation5 + $0x810] sm:$0xf]  ;;  %v4435_v32 = vld [vmem:[#allocation5 + $0x814] sm:$0xf0]  ;;  %v2843_v41 = vld [vmem:[#allocation5 + $0x18] sm:$0xf0] }
  0x9d   :  { %2099 = vmatpush.bf16.msrb.mxu3 %v3802_v48  ;;  %v4441_v48 = vld [vmem:[#allocation5 + $0x844] sm:$0xf0]  ;;  %v4194_v42 = vld [vmem:[#allocation5 + $0x94] sm:$0xf]  ;;  %v2907_v43 = vld [vmem:[#allocation5 + $0x98] sm:$0xf0] }
  0x9e   :  { %2061 = vmatpush.bf16.msrb.mxu0 %v3602_v55  ;;  %v2931_v55 = vld [vmem:[#allocation5 + $0xc8] sm:$0xf0]  ;;  %v3890_v56 = vor.u32 %v4441_v48, %v3889_v47  ;;  %v3930_v47 = vor.u32 %v4451_v36, %v3929_v33  ;;  %v2846_v48 = vor.u32 %v4178_v39, %v2843_v41  ;;  %v2910_v52 = vor.u32 %v4194_v42, %v2907_v43  ;;  %v4218_v36 = vld [vmem:[#allocation5 + $0x154] sm:$0xf]  ;;  %v3003_v39 = vld [vmem:[#allocation5 + $0x158] sm:$0xf0] }
  0x9f   :  { %2074 = vmatpush.bf16.msrb.mxu1 %v3666_v59  ;;  %v3881_v59 = vld [vmem:[#allocation5 + $0x830] sm:$0xf]  ;;  %v2934_v62 = vor.u32 %v4200_v54, %v2931_v55  ;;  %v4192_v54 = vld [vmem:[#allocation5 + $0x84] sm:$0xf]  ;;  %v2899_v55 = vld [vmem:[#allocation5 + $0x88] sm:$0xf0] }
  0xa0   :  { %2087 = vmatpush.bf16.msrb.mxu2 %v3730_v60  ;;  %v4439_v60 = vld [vmem:[#allocation5 + $0x834] sm:$0xf0]  ;;  %v4234_v41 = vld [vmem:[#allocation5 + $0x1d4] sm:$0xf]  ;;  %v3067_v43 = vld [vmem:[#allocation5 + $0x1d8] sm:$0xf0] }
  0xa1   :  { %2100 = vmatpush.bf16.msrb.mxu3 %v3794_v0  ;;  %2062 = vmatmul.bf16.vlgmr.msrb.gmra.mxu0 %v4841_v13  ;;  %v4182_v0 = vld [vmem:[#allocation5 + $0x34] sm:$0xf]  ;;  %v3882_v4 = vor.u32 %v4439_v60, %v3881_v59  ;;  %v3083_v60 = vld [vmem:[#allocation5 + $0x1f8] sm:$0xf0] }
  0xa2   :  { %2106 = vmatpush.bf16.msra.mxu0 %v3914_v1  ;;  %2075 = vmatmul.bf16.vlgmr.msrb.gmra.mxu1 %v4845_v20  ;;  %v2859_v1 = vld [vmem:[#allocation5 + $0x38] sm:$0xf0] }
  0xa3   :  { %2119 = vmatpush.bf16.msra.mxu1 %v3978_v5  ;;  %2088 = vmatmul.bf16.vlgmr.msrb.gmra.mxu2 %v4843_v19  ;;  %v3946_v5 = vor.u32 %v4455_v63, %v3945_v61  ;;  %v4254_v61 = vld [vmem:[#allocation5 + $0x274] sm:$0xf] }
  0xa4   :  { %2132 = vmatpush.bf16.msra.mxu2 %v2894_v6  ;;  %2101 = vmatmul.bf16.vlgmr.msrb.gmra.mxu3 %v4847_v26  ;;  %v2862_v6 = vor.u32 %v4182_v0, %v2859_v1  ;;  %v2838_v0 = vor.u32 %v4176_v51, %v2835_v53  ;;  %v4270_v1 = vld [vmem:[#allocation5 + $0x2f4] sm:$0xf]  ;;  %v4232_v53 = vld [vmem:[#allocation5 + $0x1c4] sm:$0xf] }
  0xa5   :  { %2145 = vmatpush.bf16.msra.mxu3 %v2958_v12  ;;  %v2926_v12 = vor.u32 %v4198_v2, %v2923_v3  ;;  %v3211_v2 = vld [vmem:[#allocation5 + $0x2f8] sm:$0xf0]  ;;  %v144_v3 = vld [vmem:[#allocation2 + $0x80] sm:$0xff] }
  0xa6   :  { %2107 = vmatpush.bf16.msra.mxu0 %v3906_v28  ;;  %v3874_v28 = vor.u32 %v4437_v10, %v3873_v7 }
  0xa7   :  { %2120 = vmatpush.bf16.msra.mxu1 %v3970_v29  ;;  %v3938_v29 = vor.u32 %v4453_v14, %v3937_v11  ;;  %v4220_v11 = vld [vmem:[#allocation5 + $0x164] sm:$0xf] }
  0xa8   :  { %2133 = vmatpush.bf16.msra.mxu2 %v2886_v30  ;;  %v2854_v30 = vor.u32 %v4180_v16, %v2851_v17  ;;  %v4236_v14 = vld [vmem:[#allocation5 + $0x1e4] sm:$0xf]  ;;  %v3214_v16 = vor.u32 %v4270_v1, %v3211_v2  ;;  %v4853_v17 = vpack.c.bf16 %v144_v3, %v144_v3  ;;  %v3051_v3 = vld [vmem:[#allocation5 + $0x1b8] sm:$0xf0] }
  0xa9   :  { %2146 = vmatpush.bf16.msra.mxu3 %v2950_v35  ;;  %v2918_v35 = vor.u32 %v4196_v21, %v2915_v24  ;;  %v3075_v21 = vld [vmem:[#allocation5 + $0x1e8] sm:$0xf0]  ;;  %v4252_v24 = vld [vmem:[#allocation5 + $0x264] sm:$0xf] }
  0xaa   :  { %2108 = vmatpush.bf16.msra.mxu0 %v3898_v44  ;;  %v3866_v44 = vor.u32 %v4435_v32, %v3865_v31  ;;  %v3203_v31 = vld [vmem:[#allocation5 + $0x2e8] sm:$0xf0]  ;;  %v3078_v33 = vor.u32 %v4236_v14, %v3075_v21 }
  0xab   :  { %2121 = vmatpush.bf16.msra.mxu1 %v3962_v45  ;;  %v3857_v45 = vld [vmem:[#allocation5 + $0x800] sm:$0xf]  ;;  %v2979_v21 = vld [vmem:[#allocation5 + $0x128] sm:$0xf0] }
  0xac   :  { %2134 = vmatpush.bf16.msra.mxu2 %v2878_v46  ;;  %v4433_v46 = vld [vmem:[#allocation5 + $0x804] sm:$0xf0] }
  0xad   :  { %2147 = vmatpush.bf16.msra.mxu3 %v2942_v50  ;;  %v4449_v50 = vld [vmem:[#allocation5 + $0x884] sm:$0xf0]  ;;  %v3858_v59 = vor.u32 %v4433_v46, %v3857_v45  ;;  %v3131_v45 = vld [vmem:[#allocation5 + $0x258] sm:$0xf0]  ;;  %v4266_v46 = vld [vmem:[#allocation5 + $0x2d4] sm:$0xf] }
  0xae   :  { %2109 = vmatpush.bf16.msra.mxu0 %v3890_v56  ;;  %v4222_v56 = vld [vmem:[#allocation5 + $0x174] sm:$0xf]  ;;  %v3922_v63 = vor.u32 %v4449_v50, %v3921_v49  ;;  %v4216_v49 = vld [vmem:[#allocation5 + $0x144] sm:$0xf]  ;;  %v3070_v50 = vor.u32 %v4234_v41, %v3067_v43 }
  0xaf   :  { %2122 = vmatpush.bf16.msra.mxu1 %v3954_v57  ;;  %v3019_v57 = vld [vmem:[#allocation5 + $0x178] sm:$0xf0] }
  0xb0   :  { %2135 = vmatpush.bf16.msra.mxu2 %v2870_v58  ;;  %v4238_v58 = vld [vmem:[#allocation5 + $0x1f4] sm:$0xf] }
  0xb1   :  { %2148 = vmatpush.bf16.msra.mxu3 %v2934_v62  ;;  %v3147_v62 = vld [vmem:[#allocation5 + $0x278] sm:$0xf0]  ;;  %v3086_v7 = vor.u32 %v4238_v58, %v3083_v60  ;;  %v452_v58 = vld [vmem:[#allocation7] sm:$0x3]  ;;  %v3187_v60 = vld [vmem:[#allocation5 + $0x2c8] sm:$0xf0] }
  0xb2   :  { %2110 = vmatpush.bf16.msra.mxu0 %v3882_v4  ;;  %v2902_v4 = vor.u32 %v4192_v54, %v2899_v55  ;;  %v3150_v10 = vor.u32 %v4254_v61, %v3147_v62  ;;  %v3059_v54 = vld [vmem:[#allocation5 + $0x1c8] sm:$0xf0]  ;;  %v4214_v61 = vld [vmem:[#allocation5 + $0x134] sm:$0xf]  ;;  %v454_v1 = vperm.slane %v452_v58, 0 }
  0xb3   :  { %2123 = vmatpush.bf16.msra.mxu1 %v3946_v5  ;;  %v3022_v5 = vor.u32 %v4222_v56, %v3019_v57  ;;  %v4248_v56 = vld [vmem:[#allocation5 + $0x244] sm:$0xf]  ;;  %v3123_v57 = vld [vmem:[#allocation5 + $0x248] sm:$0xf0] }
  0xb4   :  { %2136 = vmatpush.bf16.msra.mxu2 %v2862_v6  ;;  %v145_v6 = vld [vmem:[#allocation2 + $0x88] sm:$0xff]  ;;  %v3126_v62 = vor.u32 %v4248_v56, %v3123_v57  ;;  %v4208_v58 = vld [vmem:[#allocation5 + $0x104] sm:$0xf] }
  0xb5   :  { %2149 = vmatpush.bf16.msra.mxu3 %v2926_v12  ;;  %v3011_v12 = vld [vmem:[#allocation5 + $0x168] sm:$0xf0] }
  0xb6   :  { %2111 = vmatpush.bf16.msra.mxu0 %v3874_v28  ;;  %v3139_v28 = vld [vmem:[#allocation5 + $0x268] sm:$0xf0]  ;;  %v3014_v32 = vor.u32 %v4220_v11, %v3011_v12 }
  0xb7   :  { %2124 = vmatpush.bf16.msra.mxu1 %v3938_v29  ;;  %v4855_v29 = vpack.c.bf16 %v145_v6, %v145_v6  ;;  %v4262_v6 = vld [vmem:[#allocation5 + $0x2b4] sm:$0xf] }
  0xb8   :  { %2137 = vmatpush.bf16.msra.mxu2 %v2854_v30  ;;  %v4268_v30 = vld [vmem:[#allocation5 + $0x2e4] sm:$0xf] }
  0xb9   :  { %2150 = vmatpush.bf16.msra.mxu3 %v2918_v35  ;;  %v3142_v35 = vor.u32 %v4252_v24, %v3139_v28  ;;  %v3206_v42 = vor.u32 %v4268_v30, %v3203_v31  ;;  %v4228_v24 = vld [vmem:[#allocation5 + $0x1a4] sm:$0xf]  ;;  %v3043_v31 = vld [vmem:[#allocation5 + $0x1a8] sm:$0xf0] }
  0xba   :  { %2112 = vmatpush.bf16.msra.mxu0 %v3866_v44  ;;  %v4250_v44 = vld [vmem:[#allocation5 + $0x254] sm:$0xf] }
  0xbb   :  { %2125 = vmatpush.bf16.msra.mxu1 %v3930_v47  ;;  %v3195_v47 = vld [vmem:[#allocation5 + $0x2d8] sm:$0xf0]  ;;  %v3134_v51 = vor.u32 %v4250_v44, %v3131_v45  ;;  %v4210_v44 = vld [vmem:[#allocation5 + $0x114] sm:$0xf] }
  0xbc   :  { %2138 = vmatpush.bf16.msra.mxu2 %v2846_v48  ;;  %v3006_v48 = vor.u32 %v4218_v36, %v3003_v39  ;;  %v3198_v55 = vor.u32 %v4266_v46, %v3195_v47  ;;  %v3171_v36 = vld [vmem:[#allocation5 + $0x2a8] sm:$0xf0]  ;;  %v2971_v45 = vld [vmem:[#allocation5 + $0x118] sm:$0xf0]  ;;  %v4226_v46 = vld [vmem:[#allocation5 + $0x194] sm:$0xf] }
  0xbd   :  { %2151 = vmatpush.bf16.msra.mxu3 %v2910_v52  ;;  %v2995_v52 = vld [vmem:[#allocation5 + $0x148] sm:$0xf0]  ;;  %v2974_v57 = vor.u32 %v4210_v44, %v2971_v45 }
  0xbe   :  { %2113 = vmatpush.bf16.msra.mxu0 %v3858_v59  ;;  %v4264_v59 = vld [vmem:[#allocation5 + $0x2c4] sm:$0xf]  ;;  %v1907_v11 = vpop.f32.mrf.mxu0  ;;  %v3331_v45 = vld [vmem:[#allocation5 + $0x3e8] sm:$0xf0] }
  0xbf   :  { %2126 = vmatpush.bf16.msra.mxu1 %v3922_v63  ;;  %v2987_v63 = vld [vmem:[#allocation5 + $0x138] sm:$0xf0]  ;;  %v3190_v2 = vor.u32 %v4264_v59, %v3187_v60  ;;  %v1908_v28 = vadd.f32 %v1907_v11, %v454_v1  ;;  %v1920_v41 = vpop.f32.mrf.mxu1  ;;  %v2963_v59 = vld [vmem:[#allocation5 + $0x108] sm:$0xf0] }
  0xc0   :  { %2139 = vmatpush.bf16.msra.mxu2 %v2838_v0  ;;  %v4230_v0 = vld [vmem:[#allocation5 + $0x1b4] sm:$0xf]  ;;  %v3339_v11 = vld [vmem:[#allocation5 + $0x3f8] sm:$0xf0] }
  0xc1   :  { %2152 = vmatpush.bf16.msra.mxu3 %v2902_v4  ;;  %2114 = vmatmul.bf16.vlgmr.msra.gmra.mxu0 %v4853_v17  ;;  %v4246_v4 = vld [vmem:[#allocation5 + $0x234] sm:$0xf]  ;;  %v3054_v12 = vor.u32 %v4230_v0, %v3051_v3  ;;  %v1921_v47 = vadd.f32 %v1920_v41, %v1908_v28  ;;  %v4256_v3 = vld [vmem:[#allocation5 + $0x284] sm:$0xf]  ;;  %v3267_v41 = vld [vmem:[#allocation5 + $0x368] sm:$0xf0] }
  0xc2   :  { %2158 = vmatpush.bf16.msrb.mxu0 %v3022_v5  ;;  %2127 = vmatmul.bf16.vlgmr.msra.gmra.mxu1 %v4855_v29  ;;  %v3115_v5 = vld [vmem:[#allocation5 + $0x238] sm:$0xf0]  ;;  %v4334_v28 = vld [vmem:[#allocation5 + $0x4f4] sm:$0xf] }
  0xc3   :  { %2171 = vmatpush.bf16.msrb.mxu1 %v3086_v7  ;;  %2140 = vmatmul.bf16.vlgmr.msra.gmra.mxu2 %v4807_v9  ;;  %v2998_v9 = vor.u32 %v4216_v49, %v2995_v52  ;;  %v3179_v7 = vld [vmem:[#allocation5 + $0x2b8] sm:$0xf0]  ;;  %v3118_v14 = vor.u32 %v4246_v4, %v3115_v5  ;;  %v3155_v4 = vld [vmem:[#allocation5 + $0x288] sm:$0xf0]  ;;  %v4286_v5 = vld [vmem:[#allocation5 + $0x374] sm:$0xf] }
  0xc4   :  { %2184 = vmatpush.bf16.msrb.mxu2 %v3150_v10  ;;  %2153 = vmatmul.bf16.vlgmr.msra.gmra.mxu3 %v4814_v25  ;;  %v3062_v25 = vor.u32 %v4232_v53, %v3059_v54  ;;  %v2990_v10 = vor.u32 %v4214_v61, %v2987_v63  ;;  %v3182_v30 = vor.u32 %v4262_v6, %v3179_v7  ;;  %v3035_v49 = vld [vmem:[#allocation5 + $0x198] sm:$0xf0]  ;;  %v4258_v53 = vld [vmem:[#allocation5 + $0x294] sm:$0xf]  ;;  %v4240_v63 = vld [vmem:[#allocation5 + $0x204] sm:$0xf] }
  0xc5   :  { %2197 = vmatpush.bf16.msrb.mxu3 %v3214_v16  ;;  %v4212_v16 = vld [vmem:[#allocation5 + $0x124] sm:$0xf]  ;;  %v3163_v54 = vld [vmem:[#allocation5 + $0x298] sm:$0xf0]  ;;  %v4302_v7 = vld [vmem:[#allocation5 + $0x3f4] sm:$0xf] }
  0xc6   :  { %2159 = vmatpush.bf16.msrb.mxu0 %v3014_v32  ;;  %v4244_v32 = vld [vmem:[#allocation5 + $0x224] sm:$0xf]  ;;  %v2982_v39 = vor.u32 %v4212_v16, %v2979_v21  ;;  %v1933_v52 = vpop.f32.mrf.mxu2  ;;  %v1909_v60 = vpop.f32.mrf.mxu0  ;;  %v3166_v1 = vor.u32 %v4258_v53, %v3163_v54  ;;  %v3275_v6 = vld [vmem:[#allocation5 + $0x378] sm:$0xf0]  ;;  %v4282_v53 = vld [vmem:[#allocation5 + $0x354] sm:$0xf] }
  0xc7   :  { %2172 = vmatpush.bf16.msrb.mxu1 %v3078_v33  ;;  %v3107_v33 = vld [vmem:[#allocation5 + $0x228] sm:$0xf0]  ;;  %v1946_v56 = vpop.f32.mrf.mxu3  ;;  %v1922_v16 = vpop.f32.mrf.mxu1  ;;  %v3259_v54 = vld [vmem:[#allocation5 + $0x358] sm:$0xf0]  ;;  %v4330_v60 = vld [vmem:[#allocation5 + $0x4d4] sm:$0xf] }
  0xc8   :  { %2185 = vmatpush.bf16.msrb.mxu2 %v3142_v35  ;;  %v4260_v35 = vld [vmem:[#allocation5 + $0x2a4] sm:$0xf]  ;;  %v3110_v43 = vor.u32 %v4244_v32, %v3107_v33  ;;  %v3278_v32 = vor.u32 %v4286_v5, %v3275_v6  ;;  %v3379_v5 = vld [vmem:[#allocation5 + $0x448] sm:$0xf0] }
  0xc9   :  { %2198 = vmatpush.bf16.msrb.mxu3 %v3206_v42  ;;  %v3046_v42 = vor.u32 %v4228_v24, %v3043_v31  ;;  %v3158_v31 = vor.u32 %v4256_v3, %v3155_v4  ;;  %v3315_v3 = vld [vmem:[#allocation5 + $0x3c8] sm:$0xf0]  ;;  %v4312_v4 = vld [vmem:[#allocation5 + $0x444] sm:$0xf] }
  0xca   :  { %2160 = vmatpush.bf16.msrb.mxu0 %v3006_v48  ;;  %v3174_v48 = vor.u32 %v4260_v35, %v3171_v36  ;;  %v3342_v35 = vor.u32 %v4302_v7, %v3339_v11  ;;  %v4328_v6 = vld [vmem:[#allocation5 + $0x4c4] sm:$0xf]  ;;  %v4278_v11 = vld [vmem:[#allocation5 + $0x334] sm:$0xf] }
  0xcb   :  { %2173 = vmatpush.bf16.msrb.mxu1 %v3070_v50  ;;  %v4242_v50 = vld [vmem:[#allocation5 + $0x214] sm:$0xf] }
  0xcc   :  { %2186 = vmatpush.bf16.msrb.mxu2 %v3134_v51  ;;  %v3099_v51 = vld [vmem:[#allocation5 + $0x218] sm:$0xf0] }
  0xcd   :  { %2199 = vmatpush.bf16.msrb.mxu3 %v3198_v55  ;;  %v1934_v55 = vadd.f32 %v1933_v52, %v1921_v47  ;;  %v3102_v61 = vor.u32 %v4242_v50, %v3099_v51  ;;  %v3395_v47 = vld [vmem:[#allocation5 + $0x468] sm:$0xf0] }
  0xce   :  { %2161 = vmatpush.bf16.msrb.mxu0 %v2998_v9  ;;  %v3038_v9 = vor.u32 %v4226_v46, %v3035_v49  ;;  %v1935_v33 = vpop.f32.mrf.mxu2  ;;  %v4316_v46 = vld [vmem:[#allocation5 + $0x464] sm:$0xf]  ;;  %v3459_v49 = vld [vmem:[#allocation5 + $0x4e8] sm:$0xf0] }
  0xcf   :  { %2174 = vmatpush.bf16.msrb.mxu1 %v3062_v25  ;;  %v4224_v25 = vld [vmem:[#allocation5 + $0x184] sm:$0xf]  ;;  %v4861_v0 = vadd.f32 %v1946_v56, %v1934_v55  ;;  %v3398_v52 = vor.u32 %v4316_v46, %v3395_v47  ;;  %v4298_v55 = vld [vmem:[#allocation5 + $0x3d4] sm:$0xf]  ;;  %v3435_v33 = vld [vmem:[#allocation5 + $0x4b8] sm:$0xf0] }
  0xd0   :  { %2187 = vmatpush.bf16.msrb.mxu2 %v3126_v62  ;;  %v3027_v62 = vld [vmem:[#allocation5 + $0x188] sm:$0xf0]  ;;  %v4308_v47 = vld [vmem:[#allocation5 + $0x424] sm:$0xf] }
  0xd1   :  { %2200 = vmatpush.bf16.msrb.mxu3 %v3190_v2  ;;  %v3091_v2 = vld [vmem:[#allocation5 + $0x208] sm:$0xf0]  ;;  %v3030_v21 = vor.u32 %v4224_v25, %v3027_v62 }
  0xd2   :  { %2162 = vmatpush.bf16.msrb.mxu0 %v2990_v10  ;;  %v2966_v10 = vor.u32 %v4208_v58, %v2963_v59  ;;  %v3094_v24 = vor.u32 %v4240_v63, %v3091_v2  ;;  %v4314_v58 = vld [vmem:[#allocation5 + $0x454] sm:$0xf]  ;;  %v3387_v59 = vld [vmem:[#allocation5 + $0x458] sm:$0xf0]  ;;  %v4280_v63 = vld [vmem:[#allocation5 + $0x344] sm:$0xf] }
  0xd3   :  { %2175 = vmatpush.bf16.msrb.mxu1 %v3054_v12  ;;  %v4318_v12 = vld [vmem:[#allocation5 + $0x474] sm:$0xf]  ;;  %v3390_v62 = vor.u32 %v4314_v58, %v3387_v59  ;;  %v3299_v46 = vld [vmem:[#allocation5 + $0x3a8] sm:$0xf0]  ;;  %v3227_v59 = vld [vmem:[#allocation5 + $0x318] sm:$0xf0] }
  0xd4   :  { %2188 = vmatpush.bf16.msrb.mxu2 %v3118_v14  ;;  %v3403_v14 = vld [vmem:[#allocation5 + $0x478] sm:$0xf0]  ;;  %v4274_v58 = vld [vmem:[#allocation5 + $0x314] sm:$0xf] }
  0xd5   :  { %2201 = vmatpush.bf16.msrb.mxu3 %v3182_v30  ;;  %v3467_v30 = vld [vmem:[#allocation5 + $0x4f8] sm:$0xf0]  ;;  %v3406_v36 = vor.u32 %v4318_v12, %v3403_v14  ;;  %v4294_v14 = vld [vmem:[#allocation5 + $0x3b4] sm:$0xf] }
  0xd6   :  { %2163 = vmatpush.bf16.msrb.mxu0 %v2982_v39  ;;  %v4284_v39 = vld [vmem:[#allocation5 + $0x364] sm:$0xf]  ;;  %v3470_v44 = vor.u32 %v4334_v28, %v3467_v30  ;;  %v3243_v12 = vld [vmem:[#allocation5 + $0x338] sm:$0xf0]  ;;  %v4310_v30 = vld [vmem:[#allocation5 + $0x434] sm:$0xf] }
  0xd7   :  { %2176 = vmatpush.bf16.msrb.mxu1 %v3046_v42  ;;  %v4300_v42 = vld [vmem:[#allocation5 + $0x3e4] sm:$0xf]  ;;  %v3270_v50 = vor.u32 %v4284_v39, %v3267_v41  ;;  %v3307_v28 = vld [vmem:[#allocation5 + $0x3b8] sm:$0xf0] }
  0xd8   :  { %2189 = vmatpush.bf16.msrb.mxu2 %v3110_v43  ;;  %v1948_v43 = vpop.f32.mrf.mxu3  ;;  %v3334_v51 = vor.u32 %v4300_v42, %v3331_v45  ;;  %v3310_v39 = vor.u32 %v4294_v14, %v3307_v28  ;;  %v4276_v42 = vld [vmem:[#allocation5 + $0x324] sm:$0xf]  ;;  %v3411_v14 = vld [vmem:[#allocation5 + $0x488] sm:$0xf0]  ;;  %v4366_v28 = vld [vmem:[#allocation5 + $0x5f4] sm:$0xf] }
  0xd9   :  { %2202 = vmatpush.bf16.msrb.mxu3 %v3174_v48  ;;  %v4332_v48 = vld [vmem:[#allocation5 + $0x4e4] sm:$0xf]  ;;  %v3235_v43 = vld [vmem:[#allocation5 + $0x328] sm:$0xf0] }
  0xda   :  { %2164 = vmatpush.bf16.msrb.mxu0 %v2974_v57  ;;  %v3462_v56 = vor.u32 %v4332_v48, %v3459_v49  ;;  %v3323_v57 = vld [vmem:[#allocation5 + $0x3d8] sm:$0xf0]  ;;  %v3363_v48 = vld [vmem:[#allocation5 + $0x428] sm:$0xf0] }
  0xdb   :  { %2177 = vmatpush.bf16.msrb.mxu1 %v3038_v9  ;;  %v3451_v9 = vld [vmem:[#allocation5 + $0x4d8] sm:$0xf0]  ;;  %v3326_v25 = vor.u32 %v4298_v55, %v3323_v57  ;;  %v3366_v57 = vor.u32 %v4308_v47, %v3363_v48  ;;  %v4364_v47 = vld [vmem:[#allocation5 + $0x5e4] sm:$0xf] }
  0xdc   :  { %2190 = vmatpush.bf16.msrb.mxu2 %v3102_v61  ;;  %v3262_v61 = vor.u32 %v4282_v53, %v3259_v54  ;;  %v3454_v2 = vor.u32 %v4330_v60, %v3451_v9  ;;  %v3238_v53 = vor.u32 %v4276_v42, %v3235_v43  ;;  %v4290_v60 = vld [vmem:[#allocation5 + $0x394] sm:$0xf] }
  0xdd   :  { %2203 = vmatpush.bf16.msrb.mxu3 %v3166_v1  ;;  %v3251_v1 = vld [vmem:[#allocation5 + $0x348] sm:$0xf0] }
  0xde   :  { %2165 = vmatpush.bf16.msrb.mxu0 %v2966_v10  ;;  %v1959_v7 = vpop.f32.mrf.mxu0  ;;  %v3382_v10 = vor.u32 %v4312_v4, %v3379_v5  ;;  %v3219_v4 = vld [vmem:[#allocation5 + $0x308] sm:$0xf0] }
  0xdf   :  { %2178 = vmatpush.bf16.msrb.mxu1 %v3030_v21  ;;  %v1960_v16 = vadd.f32 %v1959_v7, %v4861_v0  ;;  %v1972_v21 = vpop.f32.mrf.mxu1  ;;  %v4304_v7 = vld [vmem:[#allocation5 + $0x404] sm:$0xf] }
  0xe0   :  { %2191 = vmatpush.bf16.msrb.mxu2 %v3094_v24 }
  0xe1   :  { %2204 = vmatpush.bf16.msrb.mxu3 %v3158_v31  ;;  %2166 = vmatmul.bf16.vlgmr.msrb.gmra.mxu0 %v4805_v8  ;;  %v3443_v8 = vld [vmem:[#allocation5 + $0x4c8] sm:$0xf0]  ;;  %v3371_v31 = vld [vmem:[#allocation5 + $0x438] sm:$0xf0] }
  0xe2   :  { %2210 = vmatpush.bf16.msra.mxu0 %v3278_v32  ;;  %2179 = vmatmul.bf16.vlgmr.msrb.gmra.mxu1 %v4809_v15  ;;  %v3446_v24 = vor.u32 %v4328_v6, %v3443_v8  ;;  %v4326_v32 = vld [vmem:[#allocation5 + $0x4b4] sm:$0xf]  ;;  %v3374_v41 = vor.u32 %v4310_v30, %v3371_v31  ;;  %v4288_v8 = vld [vmem:[#allocation5 + $0x384] sm:$0xf]  ;;  %v3595_v31 = vld [vmem:[#allocation5 + $0x5f8] sm:$0xf0] }
  0xe3   :  { %2223 = vmatpush.bf16.msra.mxu1 %v3342_v35  ;;  %2192 = vmatmul.bf16.vlgmr.msrb.gmra.mxu2 %v4819_v37  ;;  %v4296_v37 = vld [vmem:[#allocation5 + $0x3c4] sm:$0xf]  ;;  %v1973_v35 = vadd.f32 %v1972_v21, %v1960_v16  ;;  %v3438_v0 = vor.u32 %v4326_v32, %v3435_v33  ;;  %v4350_v21 = vld [vmem:[#allocation5 + $0x574] sm:$0xf]  ;;  %v3659_v33 = vld [vmem:[#allocation5 + $0x678] sm:$0xf0] }
  0xe4   :  { %2236 = vmatpush.bf16.msra.mxu2 %v3406_v36  ;;  %2205 = vmatmul.bf16.vlgmr.msrb.gmra.mxu3 %v4823_v40  ;;  %v3254_v40 = vor.u32 %v4280_v63, %v3251_v1  ;;  %v3318_v15 = vor.u32 %v4296_v37, %v3315_v3  ;;  %v3246_v36 = vor.u32 %v4278_v11, %v3243_v12  ;;  %v3355_v63 = vld [vmem:[#allocation5 + $0x418] sm:$0xf0]  ;;  %v4322_v1 = vld [vmem:[#allocation5 + $0x494] sm:$0xf]  ;;  %v4272_v3 = vld [vmem:[#allocation5 + $0x304] sm:$0xf] }
  0xe5   :  { %2249 = vmatpush.bf16.msra.mxu3 %v3470_v44  ;;  %v4292_v44 = vld [vmem:[#allocation5 + $0x3a4] sm:$0xf]  ;;  %v3419_v37 = vld [vmem:[#allocation5 + $0x498] sm:$0xf0]  ;;  %v3347_v11 = vld [vmem:[#allocation5 + $0x408] sm:$0xf0]  ;;  %v3222_v30 = vor.u32 %v4272_v3, %v3219_v4 }
  0xe6   :  { %2211 = vmatpush.bf16.msra.mxu0 %v3270_v50  ;;  %v1985_v45 = vpop.f32.mrf.mxu2  ;;  %v1961_v55 = vpop.f32.mrf.mxu0  ;;  %v4320_v12 = vld [vmem:[#allocation5 + $0x484] sm:$0xf]  ;;  %v4382_v32 = vld [vmem:[#allocation5 + $0x674] sm:$0xf] }
  0xe7   :  { %2224 = vmatpush.bf16.msra.mxu1 %v3334_v51  ;;  %v1986_v49 = vadd.f32 %v1985_v45, %v1973_v35  ;;  %v1998_v50 = vpop.f32.mrf.mxu3  ;;  %v4324_v51 = vld [vmem:[#allocation5 + $0x4a4] sm:$0xf]  ;;  %v1974_v9 = vpop.f32.mrf.mxu1  ;;  %v3414_v42 = vor.u32 %v4320_v12, %v3411_v14  ;;  %v3662_v45 = vor.u32 %v4382_v32, %v3659_v33  ;;  %v4342_v14 = vld [vmem:[#allocation5 + $0x534] sm:$0xf]  ;;  %v3691_v33 = vld [vmem:[#allocation5 + $0x6b8] sm:$0xf0] }
  0xe8   :  { %2237 = vmatpush.bf16.msra.mxu2 %v3398_v52  ;;  %v3427_v52 = vld [vmem:[#allocation5 + $0x4a8] sm:$0xf0]  ;;  %v4344_v4 = vld [vmem:[#allocation5 + $0x544] sm:$0xf]  ;;  %v4390_v32 = vld [vmem:[#allocation5 + $0x6b4] sm:$0xf] }
  0xe9   :  { %2250 = vmatpush.bf16.msra.mxu3 %v3462_v56  ;;  %v4868_v54 = vadd.f32 %v1998_v50, %v1986_v49  ;;  %v3302_v56 = vor.u32 %v4292_v44, %v3299_v46  ;;  %v3598_v44 = vor.u32 %v4366_v28, %v3595_v31  ;;  %v3523_v46 = vld [vmem:[#allocation5 + $0x568] sm:$0xf0]  ;;  %v4380_v50 = vld [vmem:[#allocation5 + $0x664] sm:$0xf]  ;;  %v3563_v28 = vld [vmem:[#allocation5 + $0x5b8] sm:$0xf0] }
  0xea   :  { %2212 = vmatpush.bf16.msra.mxu0 %v3262_v61  ;;  %v3430_v61 = vor.u32 %v4324_v51, %v3427_v52  ;;  %v3587_v49 = vld [vmem:[#allocation5 + $0x5e8] sm:$0xf0]  ;;  %v4396_v52 = vld [vmem:[#allocation5 + $0x6e4] sm:$0xf]  ;;  %v3627_v31 = vld [vmem:[#allocation5 + $0x638] sm:$0xf0] }
  0xeb   :  { %2225 = vmatpush.bf16.msra.mxu1 %v3326_v25  ;;  %v3291_v25 = vld [vmem:[#allocation5 + $0x398] sm:$0xf0]  ;;  %v3651_v51 = vld [vmem:[#allocation5 + $0x668] sm:$0xf0] }
  0xec   :  { %2238 = vmatpush.bf16.msra.mxu2 %v3390_v62  ;;  %v4306_v62 = vld [vmem:[#allocation5 + $0x414] sm:$0xf]  ;;  %v3294_v5 = vor.u32 %v4290_v60, %v3291_v25 }
  0xed   :  { %2251 = vmatpush.bf16.msra.mxu3 %v3454_v2  ;;  %v3230_v2 = vor.u32 %v4274_v58, %v3227_v59  ;;  %v3358_v6 = vor.u32 %v4306_v62, %v3355_v63  ;;  %v4346_v58 = vld [vmem:[#allocation5 + $0x554] sm:$0xf]  ;;  %v3515_v59 = vld [vmem:[#allocation5 + $0x558] sm:$0xf0] }
  0xee   :  { %2213 = vmatpush.bf16.msra.mxu0 %v3254_v40  ;;  %v3283_v40 = vld [vmem:[#allocation5 + $0x388] sm:$0xf0]  ;;  %v4362_v60 = vld [vmem:[#allocation5 + $0x5d4] sm:$0xf]  ;;  %v3643_v62 = vld [vmem:[#allocation5 + $0x658] sm:$0xf0] }
  0xef   :  { %2226 = vmatpush.bf16.msra.mxu1 %v3318_v15  ;;  %v1987_v15 = vpop.f32.mrf.mxu2  ;;  %v2000_v16 = vpop.f32.mrf.mxu3  ;;  %v3286_v35 = vor.u32 %v4288_v8, %v3283_v40  ;;  %v4378_v25 = vld [vmem:[#allocation5 + $0x654] sm:$0xf]  ;;  %v3571_v8 = vld [vmem:[#allocation5 + $0x5c8] sm:$0xf0]  ;;  %v4376_v40 = vld [vmem:[#allocation5 + $0x644] sm:$0xf] }
  0xf0   :  { %2239 = vmatpush.bf16.msra.mxu2 %v3382_v10  ;;  %v3422_v10 = vor.u32 %v4322_v1, %v3419_v37  ;;  %v4394_v63 = vld [vmem:[#allocation5 + $0x6d4] sm:$0xf]  ;;  %v3707_v1 = vld [vmem:[#allocation5 + $0x6d8] sm:$0xf0]  ;;  %v3518_v37 = vor.u32 %v4346_v58, %v3515_v59  ;;  %v3646_v3 = vor.u32 %v4378_v25, %v3643_v62  ;;  %v3699_v15 = vld [vmem:[#allocation5 + $0x6c8] sm:$0xf0] }
  0xf1   :  { %2252 = vmatpush.bf16.msra.mxu3 %v3446_v24  ;;  %v3531_v24 = vld [vmem:[#allocation5 + $0x578] sm:$0xf0]  ;;  %v4354_v59 = vld [vmem:[#allocation5 + $0x594] sm:$0xf] }
  0xf2   :  { %2214 = vmatpush.bf16.msra.mxu0 %v3246_v36  ;;  %v3350_v36 = vor.u32 %v4304_v7, %v3347_v11  ;;  %v3534_v43 = vor.u32 %v4350_v21, %v3531_v24  ;;  %v3499_v16 = vld [vmem:[#allocation5 + $0x538] sm:$0xf0]  ;;  %v4358_v21 = vld [vmem:[#allocation5 + $0x5b4] sm:$0xf] }
  0xf3   :  { %2227 = vmatpush.bf16.msra.mxu1 %v3310_v39  ;;  %v4398_v39 = vld [vmem:[#allocation5 + $0x6f4] sm:$0xf]  ;;  %v3483_v58 = vld [vmem:[#allocation5 + $0x518] sm:$0xf0] }
  0xf4   :  { %2240 = vmatpush.bf16.msra.mxu2 %v3374_v41  ;;  %v3723_v41 = vld [vmem:[#allocation5 + $0x6f8] sm:$0xf0]  ;;  %v4386_v62 = vld [vmem:[#allocation5 + $0x694] sm:$0xf] }
  0xf5   :  { %2253 = vmatpush.bf16.msra.mxu3 %v3438_v0  ;;  %v4348_v0 = vld [vmem:[#allocation5 + $0x564] sm:$0xf]  ;;  %v3726_v48 = vor.u32 %v4398_v39, %v3723_v41  ;;  %v3611_v25 = vld [vmem:[#allocation5 + $0x618] sm:$0xf0] }
  0xf6   :  { %2215 = vmatpush.bf16.msra.mxu0 %v3238_v53  ;;  %v3715_v53 = vld [vmem:[#allocation5 + $0x6e8] sm:$0xf0]  ;;  %v3526_v55 = vor.u32 %v4348_v0, %v3523_v46  ;;  %v4340_v41 = vld [vmem:[#allocation5 + $0x524] sm:$0xf] }
  0xf7   :  { %2228 = vmatpush.bf16.msra.mxu1 %v3302_v56  ;;  %v3590_v56 = vor.u32 %v4364_v47, %v3587_v49  ;;  %v3718_v9 = vor.u32 %v4396_v52, %v3715_v53  ;;  %v3555_v0 = vld [vmem:[#allocation5 + $0x5a8] sm:$0xf0]  ;;  %v4372_v46 = vld [vmem:[#allocation5 + $0x624] sm:$0xf] }
  0xf8   :  { %2241 = vmatpush.bf16.msra.mxu2 %v3366_v57  ;;  %v3654_v57 = vor.u32 %v4380_v50, %v3651_v51  ;;  %v3619_v47 = vld [vmem:[#allocation5 + $0x628] sm:$0xf0]  ;;  %v4388_v49 = vld [vmem:[#allocation5 + $0x6a4] sm:$0xf] }
  0xf9   :  { %2254 = vmatpush.bf16.msra.mxu3 %v3430_v61  ;;  %v3579_v61 = vld [vmem:[#allocation5 + $0x5d8] sm:$0xf0]  ;;  %v3683_v50 = vld [vmem:[#allocation5 + $0x6a8] sm:$0xf0] }
  0xfa   :  { %2216 = vmatpush.bf16.msra.mxu0 %v3230_v2  ;;  %v3582_v2 = vor.u32 %v4362_v60, %v3579_v61  ;;  %v3686_v60 = vor.u32 %v4388_v49, %v3683_v50  ;;  %v4370_v61 = vld [vmem:[#allocation5 + $0x614] sm:$0xf]  ;;  %v3907_v49 = vld [vmem:[#allocation5 + $0x868] sm:$0xf0]  ;;  %v4460_v50 = vld [vmem:[#allocation5 + $0x8e4] sm:$0xf] }
  0xfb   :  { %2229 = vmatpush.bf16.msra.mxu1 %v3294_v5  ;;  %v4360_v5 = vld [vmem:[#allocation5 + $0x5c4] sm:$0xf] }
  0xfc   :  { %2242 = vmatpush.bf16.msra.mxu2 %v3358_v6  ;;  %v3710_v6 = vor.u32 %v4394_v63, %v3707_v1  ;;  %v3574_v11 = vor.u32 %v4360_v5, %v3571_v8  ;;  %v3675_v63 = vld [vmem:[#allocation5 + $0x698] sm:$0xf0]  ;;  %v3539_v5 = vld [vmem:[#allocation5 + $0x588] sm:$0xf0] }
  0xfd   :  { %2255 = vmatpush.bf16.msra.mxu3 %v3422_v10  ;;  %v3678_v8 = vor.u32 %v4386_v62, %v3675_v63  ;;  %v3963_v62 = vld [vmem:[#allocation5 + $0x8d8] sm:$0xf0] }
  0xfe   :  { %2217 = vmatpush.bf16.msra.mxu0 %v3222_v30  ;;  %v4874_v7 = vpop.f32.mrf.mxu0  ;;  %v4374_v30 = vld [vmem:[#allocation5 + $0x634] sm:$0xf] }
  0xff   :  { %2230 = vmatpush.bf16.msra.mxu1 %v3286_v35  ;;  %v4876_v10 = vpop.f32.mrf.mxu1  ;;  %v3502_v35 = vor.u32 %v4342_v14, %v3499_v16  ;;  %v3630_v39 = vor.u32 %v4374_v30, %v3627_v31 }
 0x100   :  { %2243 = vmatpush.bf16.msra.mxu2 %v3350_v36  ;;  %v3566_v36 = vor.u32 %v4358_v21, %v3563_v28  ;;  %v3851_v21 = vld [vmem:[#allocation5 + $0x7f8] sm:$0xf0] }
 0x101   :  { %2256 = vmatpush.bf16.msra.mxu3 %v3414_v42  ;;  %2218 = vmatmul.bf16.vlgmr.msra.gmra.mxu0 %v4817_v34  ;;  %v3507_v34 = vld [vmem:[#allocation5 + $0x548] sm:$0xf0]  ;;  %v3915_v28 = vld [vmem:[#allocation5 + $0x878] sm:$0xf0] }
 0x102   :  { %2262 = vmatpush.bf16.msrb.mxu0 %v3534_v43  ;;  %2231 = vmatmul.bf16.vlgmr.msra.gmra.mxu1 %v4821_v38  ;;  %v4392_v38 = vld [vmem:[#allocation5 + $0x6c4] sm:$0xf]  ;;  %v3491_v42 = vld [vmem:[#allocation5 + $0x528] sm:$0xf0] }
 0x103   :  { %2275 = vmatpush.bf16.msrb.mxu1 %v3598_v44  ;;  %2244 = vmatmul.bf16.vlgmr.msra.gmra.mxu2 %v4829_v18  ;;  %v3635_v18 = vld [vmem:[#allocation5 + $0x648] sm:$0xf0]  ;;  %v3702_v24 = vor.u32 %v4392_v38, %v3699_v15  ;;  %v4356_v43 = vld [vmem:[#allocation5 + $0x5a4] sm:$0xf]  ;;  %v3694_v44 = vor.u32 %v4390_v32, %v3691_v33  ;;  %v3494_v52 = vor.u32 %v4340_v41, %v3491_v42  ;;  %v4462_v32 = vld [vmem:[#allocation5 + $0x8f4] sm:$0xf] }
 0x104   :  { %2288 = vmatpush.bf16.msrb.mxu2 %v3662_v45  ;;  %2257 = vmatmul.bf16.vlgmr.msra.gmra.mxu3 %v4833_v23  ;;  %v3510_v23 = vor.u32 %v4344_v4, %v3507_v34  ;;  %v3638_v12 = vor.u32 %v4376_v40, %v3635_v18  ;;  %v3614_v4 = vor.u32 %v4370_v61, %v3611_v25  ;;  %v4352_v34 = vld [vmem:[#allocation5 + $0x584] sm:$0xf]  ;;  %v3603_v40 = vld [vmem:[#allocation5 + $0x608] sm:$0xf0]  ;;  %v3979_v33 = vld [vmem:[#allocation5 + $0x8f8] sm:$0xf0] }
 0x105   :  { %2301 = vmatpush.bf16.msrb.mxu3 %v3726_v48  ;;  %v4384_v18 = vld [vmem:[#allocation5 + $0x684] sm:$0xf]  ;;  %v3667_v38 = vld [vmem:[#allocation5 + $0x688] sm:$0xf0]  ;;  %v3542_v30 = vor.u32 %v4352_v34, %v3539_v5  ;;  %v3899_v61 = vld [vmem:[#allocation5 + $0x858] sm:$0xf0] }
 0x106   :  { %2263 = vmatpush.bf16.msrb.mxu0 %v3526_v55  ;;  %v4878_v45 = vpop.f32.mrf.mxu2  ;;  %v2013_v51 = vpop.f32.mrf.mxu0  ;;  %v3558_v55 = vor.u32 %v4356_v43, %v3555_v0  ;;  %v4412_v42 = vld [vmem:[#allocation5 + $0x764] sm:$0xf]  ;;  %v3779_v43 = vld [vmem:[#allocation5 + $0x768] sm:$0xf0]  ;;  %v3982_v0 = vor.u32 %v4462_v32, %v3979_v33  ;;  %v4458_v25 = vld [vmem:[#allocation5 + $0x8d4] sm:$0xf] }
 0x107   :  { %2276 = vmatpush.bf16.msrb.mxu1 %v3590_v56  ;;  %v4880_v48 = vpop.f32.mrf.mxu3  ;;  %v2026_v53 = vpop.f32.mrf.mxu1  ;;  %v3622_v56 = vor.u32 %v4372_v46, %v3619_v47  ;;  %v3843_v46 = vld [vmem:[#allocation5 + $0x7e8] sm:$0xf0]  ;;  %v4444_v47 = vld [vmem:[#allocation5 + $0x864] sm:$0xf] }
 0x108   :  { %2289 = vmatpush.bf16.msrb.mxu2 %v3654_v57  ;;  %v4338_v57 = vld [vmem:[#allocation5 + $0x514] sm:$0xf]  ;;  %v3971_v51 = vld [vmem:[#allocation5 + $0x8e8] sm:$0xf0]  ;;  %v4440_v5 = vld [vmem:[#allocation5 + $0x844] sm:$0xf] }
 0x109   :  { %2302 = vmatpush.bf16.msrb.mxu3 %v3718_v9  ;;  %v3547_v9 = vld [vmem:[#allocation5 + $0x598] sm:$0xf0]  ;;  %v3486_v1 = vor.u32 %v4338_v57, %v3483_v58  ;;  %v4426_v58 = vld [vmem:[#allocation5 + $0x7d4] sm:$0xf]  ;;  %v3827_v34 = vld [vmem:[#allocation5 + $0x7c8] sm:$0xf0] }
 0x10a   :  { %2264 = vmatpush.bf16.msrb.mxu0 %v3518_v37  ;;  %v4336_v37 = vld [vmem:[#allocation5 + $0x504] sm:$0xf]  ;;  %v3771_v57 = vld [vmem:[#allocation5 + $0x758] sm:$0xf0] }
 0x10b   :  { %2277 = vmatpush.bf16.msrb.mxu1 %v3582_v2  ;;  %v3475_v2 = vld [vmem:[#allocation5 + $0x508] sm:$0xf0]  ;;  %v4404_v33 = vld [vmem:[#allocation5 + $0x724] sm:$0xf] }
 0x10c   :  { %2290 = vmatpush.bf16.msrb.mxu2 %v3646_v3  ;;  %v3550_v3 = vor.u32 %v4354_v59, %v3547_v9  ;;  %v3478_v16 = vor.u32 %v4336_v37, %v3475_v2  ;;  %v3974_v59 = vor.u32 %v4460_v50, %v3971_v51  ;;  %v4442_v9 = vld [vmem:[#allocation5 + $0x854] sm:$0xf]  ;;  %v4408_v2 = vld [vmem:[#allocation5 + $0x744] sm:$0xf] }
 0x10d   :  { %2303 = vmatpush.bf16.msrb.mxu3 %v3710_v6  ;;  %v4368_v6 = vld [vmem:[#allocation5 + $0x604] sm:$0xf]  ;;  %v3902_v37 = vor.u32 %v4442_v9, %v3899_v61  ;;  %v3867_v9 = vld [vmem:[#allocation5 + $0x818] sm:$0xf0]  ;;  %v4450_v61 = vld [vmem:[#allocation5 + $0x894] sm:$0xf] }
 0x10e   :  { %2265 = vmatpush.bf16.msrb.mxu0 %v3510_v23  ;;  %v2039_v15 = vpop.f32.mrf.mxu2  ;;  %v4414_v23 = vld [vmem:[#allocation5 + $0x774] sm:$0xf]  ;;  %v3606_v31 = vor.u32 %v4368_v6, %v3603_v40 }
 0x10f   :  { %2278 = vmatpush.bf16.msrb.mxu1 %v3574_v11  ;;  %v3787_v11 = vld [vmem:[#allocation5 + $0x778] sm:$0xf0]  ;;  %v2052_v14 = vpop.f32.mrf.mxu3  ;;  %v4406_v15 = vld [vmem:[#allocation5 + $0x734] sm:$0xf] }
 0x110   :  { %2291 = vmatpush.bf16.msrb.mxu2 %v3638_v12  ;;  %v4430_v12 = vld [vmem:[#allocation5 + $0x7f4] sm:$0xf]  ;;  %v3819_v14 = vld [vmem:[#allocation5 + $0x7b8] sm:$0xf0] }
 0x111   :  { %2304 = vmatpush.bf16.msrb.mxu3 %v3702_v24  ;;  %v4446_v24 = vld [vmem:[#allocation5 + $0x874] sm:$0xf] }
 0x112   :  { %2266 = vmatpush.bf16.msrb.mxu0 %v3502_v35  ;;  %v3670_v35 = vor.u32 %v4384_v18, %v3667_v38  ;;  %v3918_v41 = vor.u32 %v4446_v24, %v3915_v28  ;;  %v4454_v24 = vld [vmem:[#allocation5 + $0x8b4] sm:$0xf]  ;;  %v3947_v28 = vld [vmem:[#allocation5 + $0x8b8] sm:$0xf0] }
 0x113   :  { %2279 = vmatpush.bf16.msrb.mxu1 %v3566_v36  ;;  %v3790_v36 = vor.u32 %v4414_v23, %v3787_v11  ;;  %v3755_v23 = vld [vmem:[#allocation5 + $0x738] sm:$0xf0]  ;;  %v4422_v11 = vld [vmem:[#allocation5 + $0x7b4] sm:$0xf] }
 0x114   :  { %2292 = vmatpush.bf16.msrb.mxu2 %v3630_v39  ;;  %v3854_v39 = vor.u32 %v4430_v12, %v3851_v21  ;;  %v3883_v21 = vld [vmem:[#allocation5 + $0x838] sm:$0xf0] }
 0x115   :  { %2305 = vmatpush.bf16.msrb.mxu3 %v3694_v44  ;;  %v4428_v44 = vld [vmem:[#allocation5 + $0x7e4] sm:$0xf] }
 0x116   :  { %2267 = vmatpush.bf16.msrb.mxu0 %v3494_v52  ;;  %v3782_v52 = vor.u32 %v4412_v42, %v3779_v43  ;;  %v3846_v53 = vor.u32 %v4428_v44, %v3843_v46  ;;  %v3811_v42 = vld [vmem:[#allocation5 + $0x7a8] sm:$0xf0]  ;;  %v4436_v43 = vld [vmem:[#allocation5 + $0x824] sm:$0xf] }
 0x117   :  { %2280 = vmatpush.bf16.msrb.mxu1 %v3558_v55  ;;  %v3910_v55 = vor.u32 %v4444_v47, %v3907_v49  ;;  %v3875_v44 = vld [vmem:[#allocation5 + $0x828] sm:$0xf0]  ;;  %v4452_v46 = vld [vmem:[#allocation5 + $0x8a4] sm:$0xf] }
 0x118   :  { %2293 = vmatpush.bf16.msrb.mxu2 %v3622_v56  ;;  %v4410_v56 = vld [vmem:[#allocation5 + $0x754] sm:$0xf]  ;;  %v3939_v47 = vld [vmem:[#allocation5 + $0x8a8] sm:$0xf0] }
 0x119   :  { %2306 = vmatpush.bf16.msrb.mxu3 %v3686_v60  ;;  %v3835_v60 = vld [vmem:[#allocation5 + $0x7d8] sm:$0xf0]  ;;  %v3774_v63 = vor.u32 %v4410_v56, %v3771_v57  ;;  %v4418_v57 = vld [vmem:[#allocation5 + $0x794] sm:$0xf] }
 0x11a   :  { %2268 = vmatpush.bf16.msrb.mxu0 %v3486_v1  ;;  %v3838_v1 = vor.u32 %v4426_v58, %v3835_v60  ;;  %v3739_v56 = vld [vmem:[#allocation5 + $0x718] sm:$0xf0]  ;;  %v3942_v58 = vor.u32 %v4452_v46, %v3939_v47  ;;  %v4434_v60 = vld [vmem:[#allocation5 + $0x814] sm:$0xf]  ;;  %v4017_v47 = vld [vmem:[#allocation8 + $0x40] sm:$0xf] }
 0x11b   :  { %2281 = vmatpush.bf16.msrb.mxu1 %v3550_v3  ;;  %v4424_v3 = vld [vmem:[#allocation5 + $0x7c4] sm:$0xf] }
 0x11c   :  { %2294 = vmatpush.bf16.msrb.mxu2 %v3614_v4  ;;  %v3966_v4 = vor.u32 %v4458_v25, %v3963_v62  ;;  %v3830_v18 = vor.u32 %v4424_v3, %v3827_v34  ;;  %v3931_v25 = vld [vmem:[#allocation5 + $0x898] sm:$0xf0]  ;;  %v2012_v62 = vadd.f32 %v4874_v7, %v4868_v54  ;;  %v4416_v3 = vld [vmem:[#allocation5 + $0x784] sm:$0xf] }
 0x11d   :  { %2307 = vmatpush.bf16.msrb.mxu3 %v3678_v8  ;;  %v3955_v8 = vld [vmem:[#allocation5 + $0x8c8] sm:$0xf0]  ;;  %v3934_v34 = vor.u32 %v4450_v61, %v3931_v25  ;;  %v4001_v61 = vld [vmem:[#allocation8 + $0x20] sm:$0xf] }
 0x11e   :  { %2269 = vmatpush.bf16.msrb.mxu0 %v3478_v16  ;;  %v4886_v6 = vpop.f32.mrf.mxu0  ;;  %v4438_v16 = vld [vmem:[#allocation5 + $0x834] sm:$0xf]  ;;  %v2025_v7 = vadd.f32 %v4876_v10, %v2012_v62  ;;  %v4469_v25 = vld [vmem:[#allocation8 + $0x24] sm:$0xf0]  ;;  %v4468_v62 = vld [vmem:[#allocation8 + $0x24] sm:$0xf] }
 0x11f   :  { %2282 = vmatpush.bf16.msrb.mxu1 %v3542_v30  ;;  %v4888_v40 = vpop.f32.mrf.mxu1  ;;  %v3758_v30 = vor.u32 %v4406_v15, %v3755_v23  ;;  %v3886_v32 = vor.u32 %v4438_v16, %v3883_v21  ;;  %v4478_v23 = vld [vmem:[#allocation8 + $0x74] sm:$0xf] }
 0x120   :  { %2295 = vmatpush.bf16.msrb.mxu2 %v3606_v31  ;;  %v3822_v31 = vor.u32 %v4422_v11, %v3819_v14  ;;  %v4043_v11 = vld [vmem:[#allocation8 + $0x78] sm:$0xf0]  ;;  %v2038_v16 = vadd.f32 %v4878_v45, %v2025_v7  ;;  %v4465_v7 = vld [vmem:[#allocation8 + $0x4] sm:$0xf0] }
 0x121   :  { %2308 = vmatpush.bf16.msrb.mxu3 %v3670_v35  ;;  %2270 = vmatmul.bf16.vlgmr.msrb.gmra.mxu0 %v4831_v22  ;;  %v3763_v22 = vld [vmem:[#allocation5 + $0x748] sm:$0xf0] }
 0x122   :  { %2314 = vmatpush.bf16.msra.mxu0 %v3790_v36  ;;  %2283 = vmatmul.bf16.vlgmr.msrb.gmra.mxu1 %v4835_v27  ;;  %v4456_v27 = vld [vmem:[#allocation5 + $0x8c4] sm:$0xf]  ;;  %v3747_v35 = vld [vmem:[#allocation5 + $0x728] sm:$0xf0]  ;;  %v2051_v10 = vadd.f32 %v4880_v48, %v2038_v16 }
 0x123   :  { %2327 = vmatpush.bf16.msra.mxu1 %v3854_v39  ;;  %2296 = vmatmul.bf16.vlgmr.msrb.gmra.mxu2 %v4841_v13  ;;  %v3891_v13 = vld [vmem:[#allocation5 + $0x848] sm:$0xf0]  ;;  %v3958_v12 = vor.u32 %v4456_v27, %v3955_v8  ;;  %v4420_v36 = vld [vmem:[#allocation5 + $0x7a4] sm:$0xf]  ;;  %v3950_v39 = vor.u32 %v4454_v24, %v3947_v28  ;;  %v3750_v50 = vor.u32 %v4404_v33, %v3747_v35 }
 0x124   :  { %2340 = vmatpush.bf16.msra.mxu2 %v3918_v41  ;;  %2309 = vmatmul.bf16.vlgmr.msrb.gmra.mxu3 %v4845_v20  ;;  %v3766_v20 = vor.u32 %v4408_v2, %v3763_v22  ;;  %v3894_v38 = vor.u32 %v4440_v5, %v3891_v13  ;;  %v3870_v2 = vor.u32 %v4434_v60, %v3867_v9  ;;  %v3731_v22 = vld [vmem:[#allocation5 + $0x708] sm:$0xf0]  ;;  %v4432_v5 = vld [vmem:[#allocation5 + $0x804] sm:$0xf] }
 0x125   :  { %2353 = vmatpush.bf16.msra.mxu3 %v3982_v0  ;;  %v3859_v13 = vld [vmem:[#allocation5 + $0x808] sm:$0xf0]  ;;  %v4448_v27 = vld [vmem:[#allocation5 + $0x884] sm:$0xf]  ;;  %v4046_v28 = vor.u32 %v4478_v23, %v4043_v11 }
 0x126   :  { %2315 = vmatpush.bf16.msra.mxu0 %v3782_v52  ;;  %v4890_v41 = vpop.f32.mrf.mxu2  ;;  %v2065_v49 = vpop.f32.mrf.mxu0  ;;  %v3814_v52 = vor.u32 %v4420_v36, %v3811_v42  ;;  %v3862_v14 = vor.u32 %v4432_v5, %v3859_v13  ;;  %v4035_v33 = vld [vmem:[#allocation8 + $0x68] sm:$0xf0]  ;;  %v4025_v36 = vld [vmem:[#allocation8 + $0x50] sm:$0xf]  ;;  %v2064_v42 = vadd.f32 %v4886_v6, %v2051_v10  ;;  %v4464_v23 = vld [vmem:[#allocation8 + $0x4] sm:$0xf] }
 0x127   :  { %2328 = vmatpush.bf16.msra.mxu1 %v3846_v53  ;;  %v4892_v0 = vpop.f32.mrf.mxu3  ;;  %v2078_v51 = vpop.f32.mrf.mxu1  ;;  %v3878_v53 = vor.u32 %v4436_v43, %v3875_v44  ;;  %v4474_v43 = vld [vmem:[#allocation8 + $0x54] sm:$0xf]  ;;  %v4027_v44 = vld [vmem:[#allocation8 + $0x58] sm:$0xf0]  ;;  %v4473_v49 = vld [vmem:[#allocation8 + $0x44] sm:$0xf0] }
 0x128   :  { %2341 = vmatpush.bf16.msra.mxu2 %v3910_v55  ;;  %v4402_v55 = vld [vmem:[#allocation5 + $0x714] sm:$0xf]  ;;  %v4030_v46 = vor.u32 %v4474_v43, %v4027_v44  ;;  %v4019_v51 = vld [vmem:[#allocation8 + $0x48] sm:$0xf0] }
 0x129   :  { %2354 = vmatpush.bf16.msra.mxu3 %v3974_v59  ;;  %v3803_v59 = vld [vmem:[#allocation5 + $0x798] sm:$0xf0]  ;;  %v3993_v5 = vld [vmem:[#allocation8 + $0x10] sm:$0xf]  ;;  %v3987_v11 = vld [vmem:[#allocation8 + $0x8] sm:$0xf0] }
 0x12a   :  { %2316 = vmatpush.bf16.msra.mxu0 %v3774_v63  ;;  %v3742_v63 = vor.u32 %v4402_v55, %v3739_v56  ;;  %v4009_v55 = vld [vmem:[#allocation8 + $0x30] sm:$0xf]  ;;  %v4470_v56 = vld [vmem:[#allocation8 + $0x34] sm:$0xf] }
 0x12b   :  { %2329 = vmatpush.bf16.msra.mxu1 %v3838_v1  ;;  %v4400_v1 = vld [vmem:[#allocation5 + $0x704] sm:$0xf] }
 0x12c   :  { %2342 = vmatpush.bf16.msra.mxu2 %v3902_v37  ;;  %v3806_v37 = vor.u32 %v4418_v57, %v3803_v59  ;;  %v3734_v15 = vor.u32 %v4400_v1, %v3731_v22  ;;  %v4011_v57 = vld [vmem:[#allocation8 + $0x38] sm:$0xf0] }
 0x12d   :  { %2355 = vmatpush.bf16.msra.mxu3 %v3966_v4  ;;  %v3795_v4 = vld [vmem:[#allocation5 + $0x788] sm:$0xf0]  ;;  %v4014_v9 = vor.u32 %v4470_v56, %v4011_v57  ;;  %v4492_v56 = vld [vmem:[#allocation8 + $0xe4] sm:$0xf] }
 0x12e   :  { %2317 = vmatpush.bf16.msra.mxu0 %v3766_v20  ;;  %v2091_v8 = vpop.f32.mrf.mxu2  ;;  %v3923_v20 = vld [vmem:[#allocation5 + $0x888] sm:$0xf0] }
 0x12f   :  { %2330 = vmatpush.bf16.msra.mxu1 %v3830_v18  ;;  %v4041_v18 = vld [vmem:[#allocation8 + $0x70] sm:$0xf]  ;;  %v2104_v54 = vpop.f32.mrf.mxu3  ;;  %v3926_v21 = vor.u32 %v4448_v27, %v3923_v20  ;;  %v4466_v8 = vld [vmem:[#allocation8 + $0x14] sm:$0xf]  ;;  %v3995_v20 = vld [vmem:[#allocation8 + $0x18] sm:$0xf0] }
 0x130   :  { %2343 = vmatpush.bf16.msra.mxu2 %v3894_v38  ;;  %v4479_v38 = vld [vmem:[#allocation8 + $0x74] sm:$0xf0]  ;;  %v3985_v54 = vld [vmem:[#allocation8] sm:$0xf]  ;;  %v4099_v57 = vld [vmem:[#allocation8 + $0xe8] sm:$0xf0] }
 0x131   :  { %2356 = vmatpush.bf16.msra.mxu3 %v3958_v12  ;;  %v3798_v12 = vor.u32 %v4416_v3, %v3795_v4  ;;  %v4042_v24 = vor.u32 %v4479_v38, %v4041_v18  ;;  %v4002_v3 = vor.u32 %v4469_v25, %v4001_v61  ;;  %v3998_v38 = vor.u32 %v4466_v8, %v3995_v20 }
 0x132   :  { %2318 = vmatpush.bf16.msra.mxu0 %v3758_v30  ;;  %v4033_v30 = vld [vmem:[#allocation8 + $0x60] sm:$0xf]  ;;  %v3986_v16 = vor.u32 %v4465_v7, %v3985_v54  ;;  %v4484_v54 = vld [vmem:[#allocation8 + $0xa4] sm:$0xf] }
 0x133   :  { %2331 = vmatpush.bf16.msra.mxu1 %v3822_v31  ;;  %v4477_v31 = vld [vmem:[#allocation8 + $0x64] sm:$0xf0] }
 0x134   :  { %2344 = vmatpush.bf16.msra.mxu2 %v3886_v32  ;;  %v4476_v32 = vld [vmem:[#allocation8 + $0x64] sm:$0xf]  ;;  %v4034_v35 = vor.u32 %v4477_v31, %v4033_v30 }
 0x135   :  { %2357 = vmatpush.bf16.msra.mxu3 %v3950_v39  ;;  %v4038_v45 = vor.u32 %v4476_v32, %v4035_v33  ;;  %v4475_v39 = vld [vmem:[#allocation8 + $0x54] sm:$0xf0] }
 0x136   :  { %2319 = vmatpush.bf16.msra.mxu0 %v3750_v50  ;;  %v4026_v48 = vor.u32 %v4475_v39, %v4025_v36  ;;  %v4472_v50 = vld [vmem:[#allocation8 + $0x44] sm:$0xf] }
 0x137   :  { %2332 = vmatpush.bf16.msra.mxu1 %v3814_v52 }
 0x138   :  { %2345 = vmatpush.bf16.msra.mxu2 %v3878_v53  ;;  %v4022_v53 = vor.u32 %v4472_v50, %v4019_v51  ;;  %v4105_v50 = vld [vmem:[#allocation8 + $0xf0] sm:$0xf]  ;;  %v4495_v51 = vld [vmem:[#allocation8 + $0xf4] sm:$0xf0] }
 0x139   :  { %2358 = vmatpush.bf16.msra.mxu3 %v3942_v58  ;;  %v4529_v58 = vld [vmem:[#allocation7] sm:$0x3] }
 0x13a   :  { %2320 = vmatpush.bf16.msra.mxu0 %v3742_v63  ;;  %v455_v59 = vperm.slane %v4529_v58, 1  ;;  %v4003_v63 = vld [vmem:[#allocation8 + $0x28] sm:$0xf0] }
 0x13b   :  { %2333 = vmatpush.bf16.msra.mxu1 %v3806_v37 }
 0x13c   :  { %2346 = vmatpush.bf16.msra.mxu2 %v3870_v2 }
 0x13d   :  { %2359 = vmatpush.bf16.msra.mxu3 %v3934_v34  ;;  %v4006_v34 = vor.u32 %v4468_v62, %v4003_v63 }
 0x13e   :  { %2321 = vmatpush.bf16.msra.mxu0 %v3734_v15  ;;  %v2115_v52 = vpop.f32.mrf.mxu0 }
 0x13f   :  { %2334 = vmatpush.bf16.msra.mxu1 %v3798_v12 }
 0x140   :  { %2347 = vmatpush.bf16.msra.mxu2 %v3862_v14 }
 0x141   :  { %2360 = vmatpush.bf16.msra.mxu3 %v3926_v21  ;;  %2322 = vmatmul.bf16.vlgmr.msra.gmra.mxu0 %v4843_v19  ;;  %v2077_v19 = vadd.f32 %v4888_v40, %v2064_v42  ;;  %v3990_v21 = vor.u32 %v4464_v23, %v3987_v11  ;;  %v4067_v23 = vld [vmem:[#allocation8 + $0xa8] sm:$0xf0] }
 0x142   :  { %2572 = vmatpush.bf16.msrb.mxu0 %v4042_v24  ;;  %2335 = vmatmul.bf16.vlgmr.msra.gmra.mxu1 %v4847_v26  ;;  %v4018_v26 = vor.u32 %v4473_v49, %v4017_v47  ;;  %v4070_v11 = vor.u32 %v4484_v54, %v4067_v23  ;;  %v4505_v54 = vld [vmem:[#allocation11 + $0x48] sm:$0xff] }
 0x143   :  { %2348 = vmatmul.bf16.vlgmr.msra.gmra.mxu2 %v4853_v17  ;;  %v2090_v6 = vadd.f32 %v4890_v41, %v2077_v19  ;;  %v2128_v17 = vpop.f32.mrf.mxu1 }
 0x144   :  { %2598 = vmatpush.bf16.msrb.mxu2 %v4046_v28  ;;  %2361 = vmatmul.bf16.vlgmr.msra.gmra.mxu3 %v4855_v29  ;;  %v4471_v29 = vld [vmem:[#allocation8 + $0x34] sm:$0xf0] }
 0x145   :  { %v2103_v60 = vadd.f32 %v4892_v0, %v2090_v6  ;;  %v4010_v40 = vor.u32 %v4471_v29, %v4009_v55  ;;  %v4467_v0 = vld [vmem:[#allocation8 + $0x14] sm:$0xf0]  ;;  %v4493_v55 = vld [vmem:[#allocation8 + $0xe4] sm:$0xf0] }
 0x146   :  { %2573 = vmatpush.bf16.msrb.mxu0 %v4034_v35  ;;  %v2141_v1 = vpop.f32.mrf.mxu2  ;;  %v2117_v22 = vpop.f32.mrf.mxu0  ;;  %v3994_v18 = vor.u32 %v4467_v0, %v3993_v5  ;;  %v4487_v5 = vld [vmem:[#allocation8 + $0xb4] sm:$0xf0]  ;;  %v4486_v0 = vld [vmem:[#allocation8 + $0xb4] sm:$0xf] }
 0x147   :  { %v2116_v41 = vadd.f32 %v2115_v52, %v2103_v60  ;;  %v2142_v37 = vadd.f32 %v2141_v1, %v455_v59  ;;  %v2154_v2 = vpop.f32.mrf.mxu3  ;;  %v4494_v52 = vld [vmem:[#allocation8 + $0xf4] sm:$0xf]  ;;  %v4102_v59 = vor.u32 %v4492_v56, %v4099_v57  ;;  %v4089_v60 = vld [vmem:[#allocation8 + $0xd0] sm:$0xf]  ;;  %v4081_v1 = vld [vmem:[#allocation8 + $0xc0] sm:$0xf] }
 0x148   :  { %2599 = vmatpush.bf16.msrb.mxu2 %v4038_v45  ;;  %v4083_v22 = vld [vmem:[#allocation8 + $0xc8] sm:$0xf0] }
 0x149   :  { %v2155_v13 = vadd.f32 %v2154_v2, %v2142_v37  ;;  %v2129_v27 = vadd.f32 %v2128_v17, %v2116_v41  ;;  %v4107_v17 = vld [vmem:[#allocation8 + $0xf8] sm:$0xf0]  ;;  %v4489_v37 = vld [vmem:[#allocation8 + $0xc4] sm:$0xf0]  ;;  %v4488_v2 = vld [vmem:[#allocation8 + $0xc4] sm:$0xf] }
 0x14a   :  { %2574 = vmatpush.bf16.msrb.mxu0 %v4026_v48  ;;  %v4110_v29 = vor.u32 %v4494_v52, %v4107_v17  ;;  %v4091_v41 = vld [vmem:[#allocation8 + $0xd8] sm:$0xf0] }
 0x14b   :  { %v2130_v4 = vpop.f32.mrf.mxu1  ;;  %v2368_v15 = vmul.f32 0.2, %v2129_v27  ;;  %vm2366_vm0 = vcmp.gt.f32.partialorder %v2129_v27, 0.0 }
 0x14c   :  { %2600 = vmatpush.bf16.msrb.mxu2 %v4030_v46  ;;  %2611 = vmatpush.bf16.msrb.mxu3 %v4110_v29  ;;  %v4086_v4 = vor.u32 %v4488_v2, %v4083_v22  ;;  %v4509_v2 = vld [vmem:[#allocation11 + $0x68] sm:$0xff]  ;;  %v4500_v22 = vld [vmem:[#allocation11 + $0x20] sm:$0xff] }
 0x14d   :  { %v2370_v24 = vsel %vm2366_vm0, %v2129_v27, %v2368_v15  ;;  %v4075_v27 = vld [vmem:[#allocation8 + $0xb8] sm:$0xf0] }
 0x14e   :  { %2575 = vmatpush.bf16.msrb.mxu0 %v4018_v26  ;;  %v2143_v12 = vpop.f32.mrf.mxu2  ;;  %v2372_v28 = vpack.c.bf16 %v2370_v24, %v2370_v24  ;;  %v4106_v26 = vor.u32 %v4495_v51, %v4105_v50  ;;  %v4078_v8 = vor.u32 %v4486_v0, %v4075_v27  ;;  %v4059_v24 = vld [vmem:[#allocation8 + $0x98] sm:$0xf0]  ;;  %v4498_v0 = vld [vmem:[#allocation11 + $0x10] sm:$0xff] }
 0x14f   :  { %v2156_v14 = vpop.f32.mrf.mxu3  ;;  %v4057_v12 = vld [vmem:[#allocation8 + $0x90] sm:$0xf] }
 0x150   :  { %2601 = vmatpush.bf16.msrb.mxu2 %v4022_v53  ;;  %v4097_v53 = vld [vmem:[#allocation8 + $0xe0] sm:$0xf]  ;;  %2585 = vmatpush.bf16.msrb.mxu1 %v4106_v26  ;;  %v4483_v14 = vld [vmem:[#allocation8 + $0x94] sm:$0xf0] }
 0x151   :  { %v4098_v58 = vor.u32 %v4493_v55, %v4097_v53  ;;  %2612 = vmatpush.bf16.msrb.mxu3 %v4102_v59 }
 0x152   :  { %2576 = vmatpush.bf16.msrb.mxu0 %v4010_v40  ;;  %v4491_v40 = vld [vmem:[#allocation8 + $0xd4] sm:$0xf0] }
 0x153   :  { %v4090_v25 = vor.u32 %v4491_v40, %v4089_v60 }
 0x154   :  { %2602 = vmatpush.bf16.msrb.mxu2 %v4014_v9  ;;  %v4490_v9 = vld [vmem:[#allocation8 + $0xd4] sm:$0xf]  ;;  %2586 = vmatpush.bf16.msrb.mxu1 %v4098_v58 }
 0x155   :  { %v4094_v63 = vor.u32 %v4490_v9, %v4091_v41  ;;  %v4503_v9 = vld [vmem:[#allocation11 + $0x38] sm:$0xff] }
 0x156   :  { %2577 = vmatpush.bf16.msrb.mxu0 %v4002_v3  ;;  %v4082_v3 = vor.u32 %v4489_v37, %v4081_v1  ;;  %v4501_v37 = vld [vmem:[#allocation11 + $0x28] sm:$0xff] }
 0x157   :  { %2613 = vmatpush.bf16.msrb.mxu3 %v4094_v63  ;;  %v4510_v63 = vld [vmem:[#allocation11 + $0x70] sm:$0xff] }
 0x158   :  { %2603 = vmatpush.bf16.msrb.mxu2 %v4006_v34  ;;  %2587 = vmatpush.bf16.msrb.mxu1 %v4090_v25  ;;  %v4073_v34 = vld [vmem:[#allocation8 + $0xb0] sm:$0xf] }
 0x15a   :  { %2578 = vmatpush.bf16.msrb.mxu0 %v3994_v18  ;;  %v4065_v18 = vld [vmem:[#allocation8 + $0xa0] sm:$0xf] }
 0x15b   :  { %2614 = vmatpush.bf16.msrb.mxu3 %v4086_v4  ;;  %v4499_v4 = vld [vmem:[#allocation11 + $0x18] sm:$0xff] }
 0x15c   :  { %2604 = vmatpush.bf16.msrb.mxu2 %v3998_v38  ;;  %2588 = vmatpush.bf16.msrb.mxu1 %v4082_v3  ;;  %v4485_v38 = vld [vmem:[#allocation8 + $0xa4] sm:$0xf0] }
 0x15d   :  { %v4066_v15 = vor.u32 %v4485_v38, %v4065_v18  ;;  %v4508_v3 = vld [vmem:[#allocation11 + $0x60] sm:$0xff]  ;;  %v4506_v18 = vld [vmem:[#allocation11 + $0x50] sm:$0xff] }
 0x15e   :  { %2579 = vmatpush.bf16.msrb.mxu0 %v3986_v16  ;;  %v2167_v30 = vpop.f32.mrf.mxu0  ;;  %v4482_v16 = vld [vmem:[#allocation8 + $0x94] sm:$0xf]  ;;  %v4496_v38 = vld [vmem:[#allocation11] sm:$0xff] }
 0x15f   :  { %v2168_v31 = vadd.f32 %v2167_v30, %v2155_v13  ;;  %v2180_v32 = vpop.f32.mrf.mxu1  ;;  %v4074_v13 = vor.u32 %v4487_v5, %v4073_v34  ;;  %2615 = vmatpush.bf16.msrb.mxu3 %v4078_v8  ;;  %v4507_v34 = vld [vmem:[#allocation11 + $0x58] sm:$0xff] }
 0x160   :  { %2605 = vmatpush.bf16.msrb.mxu2 %v3990_v21  ;;  %v4058_v21 = vor.u32 %v4483_v14, %v4057_v12 }
 0x161   :  { %2580 = vmatmul.bf16.vlgmr.msrb.gmra.mxu0 %v2372_v28  ;;  %v2181_v33 = vadd.f32 %v2180_v32, %v2168_v31  ;;  %2589 = vmatpush.bf16.msrb.mxu1 %v4074_v13  ;;  %v4062_v31 = vor.u32 %v4482_v16, %v4059_v24 }
 0x162   :  { %2764 = vmatpush.bf16.msra.mxu0 %v4503_v9 }
 0x163   :  { %2606 = vmatmul.bf16.vlgmr.msrb.gmra.mxu2 %v2372_v28  ;;  %2616 = vmatpush.bf16.msrb.mxu3 %v4070_v11 }
 0x165   :  { %2590 = vmatpush.bf16.msrb.mxu1 %v4066_v15  ;;  %v2406_v15 = vld [vmem:[#allocation10] sm:$0x3] }
 0x166   :  { %v2193_v10 = vpop.f32.mrf.mxu2  ;;  %v2169_v39 = vpop.f32.mrf.mxu0  ;;  %v2408_v23 = vperm.slane %v2406_v15, 0  ;;  %v2409_v14 = vperm.slane %v2406_v15, 1 }
 0x167   :  { %v2194_v35 = vadd.f32 %v2193_v10, %v2181_v33  ;;  %v2206_v45 = vpop.f32.mrf.mxu3  ;;  %v2182_v42 = vpop.f32.mrf.mxu1  ;;  %2617 = vmatpush.bf16.msrb.mxu3 %v4062_v31  ;;  %v4480_v39 = vld [vmem:[#allocation8 + $0x84] sm:$0xf] }
 0x169   :  { %v4907_v36 = vadd.f32 %v2206_v45, %v2194_v35  ;;  %2591 = vmatpush.bf16.msrb.mxu1 %v4058_v21  ;;  %v4049_v35 = vld [vmem:[#allocation8 + $0x80] sm:$0xf]  ;;  %v4481_v45 = vld [vmem:[#allocation8 + $0x84] sm:$0xf0] }
 0x16a   :  { %v4050_v42 = vor.u32 %v4481_v45, %v4049_v35 }
 0x16d   :  { %2592 = vmatpush.bf16.msrb.mxu1 %v4050_v42 }
 0x16e   :  { %v2195_v43 = vpop.f32.mrf.mxu2 }
 0x16f   :  { %v2208_v44 = vpop.f32.mrf.mxu3  ;;  %v4051_v43 = vld [vmem:[#allocation8 + $0x88] sm:$0xf0] }
 0x17e   :  { %v4909_v48 = vpop.f32.mrf.mxu0 }
 0x17f   :  { %v4911_v46 = vpop.f32.mrf.mxu1  ;;  %v2220_v28 = vadd.f32 %v4909_v48, %v4907_v36 }
 0x181   :  { %v2233_v44 = vadd.f32 %v4911_v46, %v2220_v28 }
 0x186   :  { %v4913_v47 = vpop.f32.mrf.mxu2  ;;  %v2221_v19 = vpop.f32.mrf.mxu0 }
 0x187   :  { %v4915_v49 = vpop.f32.mrf.mxu3  ;;  %v2234_v6 = vpop.f32.mrf.mxu1  ;;  %v4054_v19 = vor.u32 %v4480_v39, %v4051_v43  ;;  %v2246_v50 = vadd.f32 %v4913_v47, %v2233_v44  ;;  %v4524_v43 = vld [vmem:[#allocation13] ss:$0 sm:$0xff] }
 0x189   :  { %2618 = vmatpush.bf16.msrb.mxu3 %v4054_v19  ;;  %v2259_v51 = vadd.f32 %v4915_v49, %v2246_v50 }
 0x18e   :  { %v2247_v61 = vpop.f32.mrf.mxu2 }
 0x18f   :  { %v2260_v62 = vpop.f32.mrf.mxu3  ;;  %v4511_v61 = vld [vmem:[#allocation11 + $0x78] sm:$0xff] }
 0x190   :  { %v4502_v62 = vld [vmem:[#allocation11 + $0x30] sm:$0xff]  ;;  %2777 = vmatpush.bf16.msra.mxu1 %v4511_v61 }
 0x191   :  { %2765 = vmatpush.bf16.msra.mxu0 %v4502_v62 }
 0x194   :  { %2778 = vmatpush.bf16.msra.mxu1 %v4510_v63 }
 0x195   :  { %2766 = vmatpush.bf16.msra.mxu0 %v4501_v37 }
 0x198   :  { %2779 = vmatpush.bf16.msra.mxu1 %v4509_v2 }
 0x199   :  { %2767 = vmatpush.bf16.msra.mxu0 %v4500_v22 }
 0x19c   :  { %2780 = vmatpush.bf16.msra.mxu1 %v4508_v3 }
 0x19d   :  { %2768 = vmatpush.bf16.msra.mxu0 %v4499_v4 }
 0x19e   :  { %v2271_v20 = vpop.f32.mrf.mxu0 }
 0x19f   :  { %v2284_v7 = vpop.f32.mrf.mxu1  ;;  %v2272_v52 = vadd.f32 %v2271_v20, %v2259_v51  ;;  %v4497_v20 = vld [vmem:[#allocation11 + $0x8] sm:$0xff] }
 0x1a0   :  { %2781 = vmatpush.bf16.msra.mxu1 %v4507_v34 }
 0x1a1   :  { %v2285_v6 = vadd.f32 %v2284_v7, %v2272_v52  ;;  %2769 = vmatpush.bf16.msra.mxu0 %v4498_v0  ;;  %v4504_v7 = vld [vmem:[#allocation11 + $0x40] sm:$0xff] }
 0x1a4   :  { %2782 = vmatpush.bf16.msra.mxu1 %v4506_v18 }
 0x1a5   :  { %2770 = vmatpush.bf16.msra.mxu0 %v4497_v20 }
 0x1a6   :  { %v2297_v30 = vpop.f32.mrf.mxu2  ;;  %v2273_v33 = vpop.f32.mrf.mxu0 }
 0x1a7   :  { %v2310_v32 = vpop.f32.mrf.mxu3  ;;  %v2286_v10 = vpop.f32.mrf.mxu1  ;;  %v2298_v26 = vadd.f32 %v2297_v30, %v2285_v6 }
 0x1a8   :  { %2783 = vmatpush.bf16.msra.mxu1 %v4505_v54 }
 0x1a9   :  { %v2311_v17 = vadd.f32 %v2310_v32, %v2298_v26  ;;  %2771 = vmatpush.bf16.msra.mxu0 %v4496_v38 }
 0x1ac   :  { %2784 = vmatpush.bf16.msra.mxu1 %v4504_v7 }
 0x1ae   :  { %v2299_v36 = vpop.f32.mrf.mxu2 }
 0x1af   :  { %v2312_v48 = vpop.f32.mrf.mxu3 }
 0x1be   :  { %v2323_v53 = vpop.f32.mrf.mxu0 }
 0x1bf   :  { %v2336_v55 = vpop.f32.mrf.mxu1  ;;  %v2324_v29 = vadd.f32 %v2323_v53, %v2311_v17 }
 0x1c1   :  { %v2337_v56 = vadd.f32 %v2336_v55, %v2324_v29 }
 0x1c6   :  { %v2349_v57 = vpop.f32.mrf.mxu2  ;;  %v2325_v59 = vpop.f32.mrf.mxu0 }
 0x1c7   :  { %v2350_v58 = vadd.f32 %v2349_v57, %v2337_v56  ;;  %v2362_v46 = vpop.f32.mrf.mxu3  ;;  %v2338_v60 = vpop.f32.mrf.mxu1 }
 0x1c9   :  { %v2363_v40 = vadd.f32 %v2362_v46, %v2350_v58 }
 0x1cb   :  { %vm2367_vm1 = vcmp.gt.f32.partialorder %v2363_v40, 0.0  ;;  %v2369_v47 = vmul.f32 0.2, %v2363_v40 }
 0x1cd   :  { %v2371_v25 = vsel %vm2367_vm1, %v2363_v40, %v2369_v47 }
 0x1ce   :  { %v2373_v49 = vpack.c.bf16 %v2371_v25, %v2371_v25  ;;  %v2351_v41 = vpop.f32.mrf.mxu2 }
 0x1cf   :  { %v2364_v1 = vpop.f32.mrf.mxu3 }
 0x1d0   :  { %2593 = vmatmul.bf16.vlgmr.msrb.gmra.mxu1 %v2373_v49  ;;  %2619 = vmatmul.bf16.vlgmr.msrb.gmra.mxu3 %v2373_v49 }
 0x1de   :  { %v2581_v5 = vpop.f32.mrf.mxu0 }
 0x1df   :  { %v2582_v11 = vadd.f32 %v2581_v5, %v2408_v23 }
 0x1e6   :  { %v2607_v13 = vpop.f32.mrf.mxu2  ;;  %v2583_v27 = vpop.f32.mrf.mxu0 }
 0x1e7   :  { %v2608_v24 = vadd.f32 %v2607_v13, %v2409_v14 }
 0x1ee   :  { %v2609_v8 = vpop.f32.mrf.mxu2 }
 0x24d   :  { %v2594_v12 = vpop.f32.mrf.mxu1 }
 0x24e   :  { %v2595_v16 = vadd.f32 %v2594_v12, %v2582_v11 }
 0x250   :  { %vm2624_vm2 = vcmp.gt.f32.partialorder %v2595_v16, 0.0  ;;  %v2626_v21 = vmul.f32 0.2, %v2595_v16 }
 0x252   :  { %v2628_v28 = vsel %vm2624_vm2, %v2595_v16, %v2626_v21 }
 0x253   :  { %v2630_v30 = vpack.c.bf16 %v2628_v28, %v2628_v28  ;;  %v2620_v31 = vpop.f32.mrf.mxu3 }
 0x254   :  { %v2621_v32 = vadd.f32 %v2620_v31, %v2608_v24 }
 0x255   :  { %v2596_v33 = vpop.f32.mrf.mxu1  ;;  %2772 = vmatmul.bf16.vlgmr.msra.gmra.mxu0 %v2630_v30 }
 0x256   :  { %vm2625_vm3 = vcmp.gt.f32.partialorder %v2621_v32, 0.0  ;;  %v2627_v10 = vmul.f32 0.2, %v2621_v32 }
 0x258   :  { %v2629_v35 = vsel %vm2625_vm3, %v2621_v32, %v2627_v10 }
 0x259   :  { %v2631_v45 = vpack.c.bf16 %v2629_v35, %v2629_v35 }
 0x25b   :  { %v2622_v39 = vpop.f32.mrf.mxu3  ;;  %2785 = vmatmul.bf16.vlgmr.msra.gmra.mxu1 %v2631_v45 }
 0x2d2   :  { %v2773_v42 = vpop.f32.mrf.mxu0 }
 0x2d3   :  { %v2774_v44 = vadd.f32 %v4524_v43, %v2773_v42 }
 0x2d8   :  { %v2786_v19 = vpop.f32.mrf.mxu1 }
 0x2d9   :  { %v2787_v50 = vadd.f32 %v2786_v19, %v2774_v44 }
 0x2da   :  { %v2775_v36 = vpop.f32.mrf.mxu0 }
 0x2db   :  { %v4175_v48 = vmul.f32 -1.442695, %v2787_v50 }
 0x2dd   :  { %4525 = vpow2.f32 %v4175_v48 }
 0x2e0   :  { %v2788_v51 = vpop.f32.mrf.mxu1 }
 0x2e3   :  { %v4526_v52 = vpop.eup %4525 }
 0x2e4   :  { %v2793_v6 = vadd.f32 1.0, %v4526_v52 }
 0x2e6   :  { %4527 = vrcp.f32 %v2793_v6  ;;  %v2805_v55 = vand.u32 2147483648, %v2793_v6  ;;  %v2803_v56 = vand.u32 2147483647, %v2793_v6  ;;  %vm2799_vm5 = vweird.f32 %v2793_v6 }
 0x2e8   :  { %v2806_v58 = vor.u32 1.1754944e-38, %v2805_v55  ;;  %vm2804_vm7 = vcmp.eq.f32.partialorder %v2803_v56, 8.507059e+37 }
 0x2ec   :  { %v4528_v26 = vpop.eup %4527 }
 0x2ed   :  { %v2795_v17 = vmul.f32 %v4528_v26, %v2793_v6  ;;  %vm2800_vm4 = vweird.f32 %v4528_v26 }
 0x2ee   :  { %vm2801_vm6 = vmor %vm2799_vm5, %vm2800_vm4 }
 0x2ef   :  { %v2796_v53 = vsub.f32 1.0, %v2795_v17 }
 0x2f1   :  { %v2797_v29 = vmul.f32 %v4528_v26, %v2796_v53 }
 0x2f3   :  { %v2798_v57 = vadd.f32 %v4528_v26, %v2797_v29 }
 0x2f5   :  { %v2802_v46 = vsel %vm2801_vm6, %v4528_v26, %v2798_v57 }
 0x2f6   :  { %v2807_v59 = vsel %vm2804_vm7, %v2806_v58, %v2802_v46 }
 0x2f7   :  { %v2809_v60 = vpack.c.bf16 %v2807_v59, %v2807_v59 }
 0x2f9   :  { %2810 = vst [vmem:[#allocation14] sm:$0xf] %v2809_v60 }
 0x2fa   :  { %2821 = dma.vmem_to_hbm [thread:$0]  %s2817_s6, 64, %s2819_s14, [#allocation4]  }
 0x2fb   :  { %4730 = dma.done.wait [#allocation4], 64  }
 0x2fc   :  { %4731 = vsyncadd [#allocation4], 4294967232 }
 0x2fd   :  { %2826 = vsyncpa [#allocation3], 1 }
 0x2fe   :  { %2827 = vsyncpa [#allocation6], 1 }
 0x2ff   :  { %2828 = vsyncpa [#allocation9], 1 }
 0x300   :  { %2829 = vsyncpa [#allocation12], 1 }
 0x301   :  { %2830 = vsyncpa [#allocation4], 1 }

</bundles_post_ra>
